<compile_context>
chip_gen: v7x
topology: tpu7x:2x2x1
jax: 0.10.0
libtpu: 0.0.40
codegen_flags: <defaults>
</compile_context>

<pallas_src>
import jax
import jax.numpy as jnp
from jax import lax
from jax.experimental import pallas as pl
from jax.experimental.pallas import tpu as pltpu

# ---- model hyper-parameters ----
N_DISEASE = 110          # number of disease nodes (hard-coded in the reference forward)
N_PAD = 128              # node dim padded to a full lane tile
FD = 32                  # feature size per GCN layer
VIEW = 3                 # similarity views
GCN_LAYERS = 2
C = VIEW * GCN_LAYERS    # 6 attention channels
HID = 5 * C              # fc1 hidden size = 30
HID_PAD = 32             # fc1 hidden padded to a sublane multiple
C_PAD = 8                # channel dim padded to a sublane multiple

# ---- parameter-slab layout (one contiguous (SLAB_ROWS, 96) f32 array) ----
SLAB_W = VIEW * FD                       # 96 lanes
R_W1 = 0                                 # (FD, 96)       layer-1 weights, 3 views concat
R_W2 = R_W1 + FD                         # (VIEW*FD, FD)  layer-2 weights stacked
R_FC2W = R_W2 + VIEW * FD                # (HID_PAD, C_PAD) fc2 weight (transposed, padded)
R_FC1BIG = R_FC2W + HID_PAD              # (C*FD, HID_PAD)  fc1 weight folded with group map
R_B1 = R_FC1BIG + C * FD                 # (1, 96) layer-1 biases
R_B2 = R_B1 + 1                          # (1, 96) layer-2 biases
R_FC1B = R_B2 + 1                        # (1, HID_PAD) fc1 bias
R_FC2B = R_FC1B + 1                      # (1, C_PAD)   fc2 bias
R_CNNW = R_FC2B + 1                      # (1, C_PAD)   1x1 conv weights (zero padded)
R_CNNB = R_CNNW + 1                      # (1, 1)       1x1 conv bias
SLAB_ROWS = ((R_CNNB + 1 + 7) // 8) * 8  # 360 (8-row aligned)


# ---------------------------------------------------------------------------
# Fused kernel: 6 GCN layers + channel attention + 1x1 conv, single invocation.
# ---------------------------------------------------------------------------
def _fused_forward_kernel(adj_ref, x_ref, w_ref, o_ref):
    f32 = jnp.float32
    x = x_ref[...]                                   # (N_PAD, FD), padded rows are zero
    w1 = w_ref[R_W1:R_W1 + FD, :]                    # (FD, 3*FD)
    b1 = w_ref[R_B1:R_B1 + 1, :]                     # (1, 3*FD)
    b2 = w_ref[R_B2:R_B2 + 1, :]                     # (1, 3*FD)

    # ---- 6 GCN layers: out = relu(A_hat @ (H @ W) + b) ----
    # Layer 1 shares X across the three views -> one wide MXU matmul.
    xw = jnp.dot(x, w1, preferred_element_type=f32)  # (N_PAD, 3*FD)

    ys = []                                          # channel order: t1, t2, s1, s2, g1, g2
    for v in range(VIEW):
        a = adj_ref[v]                               # (N_PAD, N_PAD), padded rows/cols zero
        lo = v * FD
        h1 = jnp.dot(a, xw[:, lo:lo + FD], preferred_element_type=f32) + b1[:, lo:lo + FD]
        h1 = jnp.maximum(h1, 0.0)                    # (N_PAD, FD)
        w2 = w_ref[R_W2 + v * FD:R_W2 + (v + 1) * FD, 0:FD]
        h2 = jnp.dot(a, jnp.dot(h1, w2, preferred_element_type=f32),
                     preferred_element_type=f32) + b2[:, lo:lo + FD]
        h2 = jnp.maximum(h2, 0.0)                    # (N_PAD, FD)
        ys += [h1, h2]

    # Lane-pack the six channels: (N_PAD, C*FD); per-view values die here.
    y = jnp.concatenate(ys, axis=1)                  # (128, 192)

    # ---- channel attention, collapsed onto the MXU ----
    # Global avg pool over the valid 110 rows of every channel via one matmul
    # (padded rows hold relu(bias) garbage and are masked out by the pool row).
    inv_cnt = 1.0 / float(N_DISEASE * FD)
    lane = lax.broadcasted_iota(jnp.int32, (C_PAD, N_PAD), 1)
    row = lax.broadcasted_iota(jnp.int32, (C_PAD, N_PAD), 0)
    pool_mat = jnp.where((lane < N_DISEASE) & (row == 0), inv_cnt, 0.0)   # (8, 128), row 0 only
    pooled = jnp.dot(pool_mat, y, preferred_element_type=f32)             # (8, 192)

    # fc1 folded with the channel-group indicator host-side: h = relu(pooled @ fc1_big + b)
    fc1_big = w_ref[R_FC1BIG:R_FC1BIG + C * FD, 0:HID_PAD]                # (192, 32)
    fc1_b = w_ref[R_FC1B:R_FC1B + 1, 0:HID_PAD]                           # (1, 32)
    h = jnp.maximum(jnp.dot(pooled, fc1_big, preferred_element_type=f32) + fc1_b, 0.0)

    # fc2 + one vectorized sigmoid (EUP); rows 1..7 carry junk and are ignored.
    fc2_wt = w_ref[R_FC2W:R_FC2W + HID_PAD, 0:C_PAD]                      # (32, 8)
    fc2_b = w_ref[R_FC2B:R_FC2B + 1, 0:C_PAD]                             # (1, 8)
    att = jax.nn.sigmoid(jnp.dot(h, fc2_wt, preferred_element_type=f32) + fc2_b)  # (8, 8)
    coef = att * w_ref[R_CNNW:R_CNNW + 1, 0:C_PAD]                        # (8, 8), row 0 valid

    # ---- attention rescale + 1x1 channel-reduction conv ----
    # relu(att * y) == att * y (att > 0, y >= 0): redundant ReLU dropped.
    acc = jnp.zeros((N_PAD, FD), f32)
    for c in range(C):
        acc = acc + coef[0:1, c:c + 1] * y[:, c * FD:(c + 1) * FD]
    o_ref[...] = acc + w_ref[R_CNNB:R_CNNB + 1, 0:1]                       # full padded output


def _vmem_spec():
    return pl.BlockSpec(memory_space=pltpu.MemorySpace.VMEM)


@jax.jit
def fused_forward(adj3, x_p, wslab):
    """Single gridless pallas_call for the whole forward pass (3 input DMAs total)."""
    out = pl.pallas_call(
        _fused_forward_kernel,
        out_shape=jax.ShapeDtypeStruct((N_PAD, FD), jnp.float32),
        in_specs=[_vmem_spec(), _vmem_spec(), _vmem_spec()],
        out_specs=_vmem_spec(),
    )(adj3, x_p, wslab)
    return out[:N_DISEASE]          # crop padded rows outside the kernel (aligned stores inside)


# ---------------------------------------------------------------------------
# One-time host-side packing (outside the hot forward).
# ---------------------------------------------------------------------------
def pack_params(p):
    f32 = jnp.float32
    w1_cat = jnp.concatenate([p["w_t1"], p["w_s1"], p["w_g1"]], axis=1)     # (FD, 3*FD)
    w2_stack = jnp.concatenate([p["w_t2"], p["w_s2"], p["w_g2"]], axis=0)   # (3*FD, FD)
    b1_cat = jnp.concatenate([p["b_t1"], p["b_s1"], p["b_g1"]])             # (3*FD,)
    b2_cat = jnp.concatenate([p["b_t2"], p["b_s2"], p["b_g2"]])

    fc1_wt = jnp.zeros((C, HID_PAD), f32).at[:, :HID].set(p["fc1_w"].T)     # (6, 32)
    fc1_big = jnp.repeat(fc1_wt, FD, axis=0)                                 # (192, 32): row k -> channel k//32
    fc1_b = jnp.zeros((HID_PAD,), f32).at[:HID].set(p["fc1_b"])
    fc2_wt = jnp.zeros((HID_PAD, C_PAD), f32).at[:HID, :C].set(p["fc2_w"].T)
    fc2_b = jnp.zeros((C_PAD,), f32).at[:C].set(p["fc2_b"])
    cnn_w = jnp.zeros((C_PAD,), f32).at[:C].set(p["cnn_w"])

    slab = jnp.zeros((SLAB_ROWS, SLAB_W), f32)
    slab = slab.at[R_W1:R_W1 + FD, :].set(w1_cat)
    slab = slab.at[R_W2:R_W2 + VIEW * FD, :FD].set(w2_stack)
    slab = slab.at[R_FC2W:R_FC2W + HID_PAD, :C_PAD].set(fc2_wt)
    slab = slab.at[R_FC1BIG:R_FC1BIG + C * FD, :HID_PAD].set(fc1_big)
    slab = slab.at[R_B1, :].set(b1_cat)
    slab = slab.at[R_B2, :].set(b2_cat)
    slab = slab.at[R_FC1B, :HID_PAD].set(fc1_b)
    slab = slab.at[R_FC2B, :C_PAD].set(fc2_b)
    slab = slab.at[R_CNNW, :C_PAD].set(cnn_w)
    slab = slab.at[R_CNNB, 0].set(p["cnn_b"][0])
    return slab


def pad_and_stack_inputs(a_t, a_s, a_g, x_d):
    pad_n = N_PAD - N_DISEASE
    adj3 = jnp.stack([jnp.pad(a, ((0, pad_n), (0, pad_n))) for a in (a_t, a_s, a_g)], axis=0)
    x_p = jnp.pad(x_d, ((0, pad_n), (0, 0)))
    return adj3, x_p


# ---------------------------------------------------------------------------
# GCN adjacency normalization (D^-1/2 (A + I) D^-1/2) and example-data helpers.
# ---------------------------------------------------------------------------
def normalize_adj(a):
    n = a.shape[0]
    a_hat = a + jnp.eye(n, dtype=a.dtype)
    deg = jnp.sum(a_hat, axis=1)
    d_inv_sqrt = jnp.where(deg > 0, 1.0 / jnp.sqrt(deg), 0.0)
    return a_hat * d_inv_sqrt[:, None] * d_inv_sqrt[None, :]


def init_params(key):
    ks = jax.random.split(key, 16)
    p = {}
    names = ["t1", "t2", "s1", "s2", "g1", "g2"]
    for i, nm in enumerate(names):
        p[f"w_{nm}"] = 0.1 * jax.random.normal(ks[i], (FD, FD), jnp.float32)
        p[f"b_{nm}"] = 0.01 * jax.random.normal(ks[i + 6], (FD,), jnp.float32)
    p["fc1_w"] = 0.1 * jax.random.normal(ks[12], (HID, C), jnp.float32)   # (out, in)
    p["fc1_b"] = jnp.zeros((HID,), jnp.float32)
    p["fc2_w"] = 0.1 * jax.random.normal(ks[13], (C, HID), jnp.float32)   # (out, in)
    p["fc2_b"] = jnp.zeros((C,), jnp.float32)
    p["cnn_w"] = 0.1 * jax.random.normal(ks[14], (C,), jnp.float32)       # 1x1 conv, C->1
    p["cnn_b"] = 0.01 * jax.random.normal(ks[15], (1,), jnp.float32)
    return p


def make_adj(key):
    m = jax.random.uniform(key, (N_DISEASE, N_DISEASE), jnp.float32)
    m = (m + m.T) * 0.5
    m = jnp.where(m > 0.7, m, 0.0)
    m = m * (1.0 - jnp.eye(N_DISEASE))
    return m


# Pure-JAX reference of the same forward pass (unfused, unpadded) for validation.
def reference_forward(params, a_t, a_s, a_g, x_d):
    def gcn(a, x, w, b):
        return jnp.maximum(a @ (x @ w) + b[None, :], 0.0)
    y_t1 = gcn(a_t, x_d, params["w_t1"], params["b_t1"])
    y_t2 = gcn(a_t, y_t1, params["w_t2"], params["b_t2"])
    y_s1 = gcn(a_s, x_d, params["w_s1"], params["b_s1"])
    y_s2 = gcn(a_s, y_s1, params["w_s2"], params["b_s2"])
    y_g1 = gcn(a_g, x_d, params["w_g1"], params["b_g1"])
    y_g2 = gcn(a_g, y_g1, params["w_g2"], params["b_g2"])
    yd = jnp.stack([y.T for y in (y_t1, y_t2, y_s1, y_s2, y_g1, y_g2)], axis=0)   # (C, fd, N)
    pooled = jnp.mean(yd, axis=(1, 2))                                            # (C,)
    h = jnp.maximum(params["fc1_w"] @ pooled + params["fc1_b"], 0.0)              # (HID,)
    att = jax.nn.sigmoid(params["fc2_w"] @ h + params["fc2_b"])                   # (C,)
    scaled = jnp.maximum(att[:, None, None] * yd, 0.0)
    out = jnp.sum(scaled * params["cnn_w"][:, None, None], axis=0) + params["cnn_b"][0]
    return out.T                                                                  # (N, fd)


if __name__ == "__main__":
    key = jax.random.PRNGKey(0)
    k_par, k_x, k_a1, k_a2, k_a3 = jax.random.split(key, 5)

    params = init_params(k_par)
    x_d = jax.random.normal(k_x, (N_DISEASE, FD), jnp.float32)
    a_t = normalize_adj(make_adj(k_a1))   # 'di_gua'
    a_s = normalize_adj(make_adj(k_a2))   # 'di_cos'
    a_g = normalize_adj(make_adj(k_a3))   # 'di_sem'

    wslab = pack_params(params)
    adj3, x_p = pad_and_stack_inputs(a_t, a_s, a_g, x_d)

    y = fused_forward(adj3, x_p, wslab)
    jax.block_until_ready(y)
    assert y.shape == (N_DISEASE, FD) and y.dtype == jnp.float32

    # Numerical check against the plain-JAX reference of the same forward pass.
    with jax.default_matmul_precision("highest"):
        y_ref = reference_forward(params, a_t, a_s, a_g, x_d)
    max_err = float(jnp.max(jnp.abs(y - y_ref)))
    assert max_err < 2e-3, f"max abs error vs reference: {max_err}"

    print("KERNEL_OK")
</pallas_src>

<mosaic_0001>
module attributes {stable_mosaic.version = 11 : i64} {
  func.func @_fused_forward_kernel(%arg0: memref<3x128x128xf32, #tpu.memory_space<vmem>>, %arg1: memref<128x32xf32, #tpu.memory_space<vmem>>, %arg2: memref<360x96xf32, #tpu.memory_space<vmem>>, %arg3: memref<128x32xf32, #tpu.memory_space<vmem>>) attributes {dimension_semantics = [], scalar_prefetch = 0 : i64, scratch_operands = 0 : i64, tpu.core_type = #tpu.core_type<tc>} {
    %c0 = arith.constant 0 : index
    %c0_0 = arith.constant 0 : index
    %0 = vector.load %arg1[%c0, %c0_0] : memref<128x32xf32, #tpu.memory_space<vmem>>, vector<128x32xf32>
    %c0_1 = arith.constant 0 : index
    %c0_2 = arith.constant 0 : index
    %1 = vector.load %arg2[%c0_1, %c0_2] : memref<360x96xf32, #tpu.memory_space<vmem>>, vector<32x96xf32>
    %c352 = arith.constant 352 : index
    %c0_3 = arith.constant 0 : index
    %2 = vector.load %arg2[%c352, %c0_3] : memref<360x96xf32, #tpu.memory_space<vmem>>, vector<1x96xf32>
    %c353 = arith.constant 353 : index
    %c0_4 = arith.constant 0 : index
    %3 = vector.load %arg2[%c353, %c0_4] : memref<360x96xf32, #tpu.memory_space<vmem>>, vector<1x96xf32>
    %cst = arith.constant dense<0.000000e+00> : vector<128x96xf32>
    %4 = tpu.matmul %0, %1, %cst {dimension_numbers = #tpu.dot_dimension_numbers<[1], [0], [0], [1], [0, 0, 1, 1], [], []>} : vector<128x32xf32>, vector<32x96xf32>, vector<128x96xf32> -> vector<128x96xf32>
    %c0_5 = arith.constant 0 : index
    %c0_6 = arith.constant 0 : index
    %c0_7 = arith.constant 0 : index
    %5 = vector.load %arg0[%c0_5, %c0_6, %c0_7] : memref<3x128x128xf32, #tpu.memory_space<vmem>>, vector<1x128x128xf32>
    %6 = vector.shape_cast %5 : vector<1x128x128xf32> to vector<128x128xf32>
    %7 = vector.extract_strided_slice %4 {offsets = [0, 0], sizes = [128, 32], strides = [1, 1]} : vector<128x96xf32> to vector<128x32xf32>
    %cst_8 = arith.constant dense<0.000000e+00> : vector<128x32xf32>
    %8 = tpu.matmul %6, %7, %cst_8 {dimension_numbers = #tpu.dot_dimension_numbers<[1], [0], [0], [1], [0, 0, 1, 1], [], []>} : vector<128x128xf32>, vector<128x32xf32>, vector<128x32xf32> -> vector<128x32xf32>
    %9 = vector.extract_strided_slice %2 {offsets = [0, 0], sizes = [1, 32], strides = [1, 1]} : vector<1x96xf32> to vector<1x32xf32>
    %10 = vector.broadcast %9 : vector<1x32xf32> to vector<128x32xf32>
    %11 = arith.addf %8, %10 : vector<128x32xf32>
    %cst_9 = arith.constant 0.000000e+00 : f32
    %12 = vector.broadcast %cst_9 : f32 to vector<128x32xf32>
    %13 = arith.maximumf %11, %12 : vector<128x32xf32>
    %c32 = arith.constant 32 : index
    %c0_10 = arith.constant 0 : index
    %14 = vector.load %arg2[%c32, %c0_10] : memref<360x96xf32, #tpu.memory_space<vmem>>, vector<32x32xf32>
    %cst_11 = arith.constant dense<0.000000e+00> : vector<128x32xf32>
    %15 = tpu.matmul %13, %14, %cst_11 {dimension_numbers = #tpu.dot_dimension_numbers<[1], [0], [0], [1], [0, 0, 1, 1], [], []>} : vector<128x32xf32>, vector<32x32xf32>, vector<128x32xf32> -> vector<128x32xf32>
    %cst_12 = arith.constant dense<0.000000e+00> : vector<128x32xf32>
    %16 = tpu.matmul %6, %15, %cst_12 {dimension_numbers = #tpu.dot_dimension_numbers<[1], [0], [0], [1], [0, 0, 1, 1], [], []>} : vector<128x128xf32>, vector<128x32xf32>, vector<128x32xf32> -> vector<128x32xf32>
    %17 = vector.extract_strided_slice %3 {offsets = [0, 0], sizes = [1, 32], strides = [1, 1]} : vector<1x96xf32> to vector<1x32xf32>
    %18 = vector.broadcast %17 : vector<1x32xf32> to vector<128x32xf32>
    %19 = arith.addf %16, %18 : vector<128x32xf32>
    %cst_13 = arith.constant 0.000000e+00 : f32
    %20 = vector.broadcast %cst_13 : f32 to vector<128x32xf32>
    %21 = arith.maximumf %19, %20 : vector<128x32xf32>
    %c1 = arith.constant 1 : index
    %c0_14 = arith.constant 0 : index
    %c0_15 = arith.constant 0 : index
    %22 = vector.load %arg0[%c1, %c0_14, %c0_15] : memref<3x128x128xf32, #tpu.memory_space<vmem>>, vector<1x128x128xf32>
    %23 = vector.shape_cast %22 : vector<1x128x128xf32> to vector<128x128xf32>
    %24 = vector.extract_strided_slice %4 {offsets = [0, 32], sizes = [128, 32], strides = [1, 1]} : vector<128x96xf32> to vector<128x32xf32>
    %cst_16 = arith.constant dense<0.000000e+00> : vector<128x32xf32>
    %25 = tpu.matmul %23, %24, %cst_16 {dimension_numbers = #tpu.dot_dimension_numbers<[1], [0], [0], [1], [0, 0, 1, 1], [], []>} : vector<128x128xf32>, vector<128x32xf32>, vector<128x32xf32> -> vector<128x32xf32>
    %26 = vector.extract_strided_slice %2 {offsets = [0, 32], sizes = [1, 32], strides = [1, 1]} : vector<1x96xf32> to vector<1x32xf32>
    %27 = vector.broadcast %26 : vector<1x32xf32> to vector<128x32xf32>
    %28 = arith.addf %25, %27 : vector<128x32xf32>
    %cst_17 = arith.constant 0.000000e+00 : f32
    %29 = vector.broadcast %cst_17 : f32 to vector<128x32xf32>
    %30 = arith.maximumf %28, %29 : vector<128x32xf32>
    %c64 = arith.constant 64 : index
    %c0_18 = arith.constant 0 : index
    %31 = vector.load %arg2[%c64, %c0_18] : memref<360x96xf32, #tpu.memory_space<vmem>>, vector<32x32xf32>
    %cst_19 = arith.constant dense<0.000000e+00> : vector<128x32xf32>
    %32 = tpu.matmul %30, %31, %cst_19 {dimension_numbers = #tpu.dot_dimension_numbers<[1], [0], [0], [1], [0, 0, 1, 1], [], []>} : vector<128x32xf32>, vector<32x32xf32>, vector<128x32xf32> -> vector<128x32xf32>
    %cst_20 = arith.constant dense<0.000000e+00> : vector<128x32xf32>
    %33 = tpu.matmul %23, %32, %cst_20 {dimension_numbers = #tpu.dot_dimension_numbers<[1], [0], [0], [1], [0, 0, 1, 1], [], []>} : vector<128x128xf32>, vector<128x32xf32>, vector<128x32xf32> -> vector<128x32xf32>
    %34 = vector.extract_strided_slice %3 {offsets = [0, 32], sizes = [1, 32], strides = [1, 1]} : vector<1x96xf32> to vector<1x32xf32>
    %35 = vector.broadcast %34 : vector<1x32xf32> to vector<128x32xf32>
    %36 = arith.addf %33, %35 : vector<128x32xf32>
    %cst_21 = arith.constant 0.000000e+00 : f32
    %37 = vector.broadcast %cst_21 : f32 to vector<128x32xf32>
    %38 = arith.maximumf %36, %37 : vector<128x32xf32>
    %c2 = arith.constant 2 : index
    %c0_22 = arith.constant 0 : index
    %c0_23 = arith.constant 0 : index
    %39 = vector.load %arg0[%c2, %c0_22, %c0_23] : memref<3x128x128xf32, #tpu.memory_space<vmem>>, vector<1x128x128xf32>
    %40 = vector.shape_cast %39 : vector<1x128x128xf32> to vector<128x128xf32>
    %41 = vector.extract_strided_slice %4 {offsets = [0, 64], sizes = [128, 32], strides = [1, 1]} : vector<128x96xf32> to vector<128x32xf32>
    %cst_24 = arith.constant dense<0.000000e+00> : vector<128x32xf32>
    %42 = tpu.matmul %40, %41, %cst_24 {dimension_numbers = #tpu.dot_dimension_numbers<[1], [0], [0], [1], [0, 0, 1, 1], [], []>} : vector<128x128xf32>, vector<128x32xf32>, vector<128x32xf32> -> vector<128x32xf32>
    %43 = vector.extract_strided_slice %2 {offsets = [0, 64], sizes = [1, 32], strides = [1, 1]} : vector<1x96xf32> to vector<1x32xf32>
    %44 = vector.broadcast %43 : vector<1x32xf32> to vector<128x32xf32>
    %45 = arith.addf %42, %44 : vector<128x32xf32>
    %cst_25 = arith.constant 0.000000e+00 : f32
    %46 = vector.broadcast %cst_25 : f32 to vector<128x32xf32>
    %47 = arith.maximumf %45, %46 : vector<128x32xf32>
    %c96 = arith.constant 96 : index
    %c0_26 = arith.constant 0 : index
    %48 = vector.load %arg2[%c96, %c0_26] : memref<360x96xf32, #tpu.memory_space<vmem>>, vector<32x32xf32>
    %cst_27 = arith.constant dense<0.000000e+00> : vector<128x32xf32>
    %49 = tpu.matmul %47, %48, %cst_27 {dimension_numbers = #tpu.dot_dimension_numbers<[1], [0], [0], [1], [0, 0, 1, 1], [], []>} : vector<128x32xf32>, vector<32x32xf32>, vector<128x32xf32> -> vector<128x32xf32>
    %cst_28 = arith.constant dense<0.000000e+00> : vector<128x32xf32>
    %50 = tpu.matmul %40, %49, %cst_28 {dimension_numbers = #tpu.dot_dimension_numbers<[1], [0], [0], [1], [0, 0, 1, 1], [], []>} : vector<128x128xf32>, vector<128x32xf32>, vector<128x32xf32> -> vector<128x32xf32>
    %51 = vector.extract_strided_slice %3 {offsets = [0, 64], sizes = [1, 32], strides = [1, 1]} : vector<1x96xf32> to vector<1x32xf32>
    %52 = vector.broadcast %51 : vector<1x32xf32> to vector<128x32xf32>
    %53 = arith.addf %50, %52 : vector<128x32xf32>
    %cst_29 = arith.constant 0.000000e+00 : f32
    %54 = vector.broadcast %cst_29 : f32 to vector<128x32xf32>
    %55 = arith.maximumf %53, %54 : vector<128x32xf32>
    %56 = tpu.concatenate %13, %21, %30, %38, %47, %55 in 1 : vector<128x32xf32>, vector<128x32xf32>, vector<128x32xf32>, vector<128x32xf32>, vector<128x32xf32>, vector<128x32xf32> -> vector<128x192xf32>
    %57 = tpu.iota {dimensions = array<i32: 1>} : vector<8x128xi32>
    %58 = tpu.iota {dimensions = array<i32: 0>} : vector<8x128xi32>
    %c110_i32 = arith.constant 110 : i32
    %59 = vector.broadcast %c110_i32 : i32 to vector<8x128xi32>
    %60 = arith.cmpi slt, %57, %59 : vector<8x128xi32>
    %c0_i32 = arith.constant 0 : i32
    %61 = vector.broadcast %c0_i32 : i32 to vector<8x128xi32>
    %62 = arith.cmpi eq, %58, %61 : vector<8x128xi32>
    %63 = arith.andi %60, %62 : vector<8x128xi1>
    %cst_30 = arith.constant 2.840909E-4 : f32
    %cst_31 = arith.constant 0.000000e+00 : f32
    %64 = vector.broadcast %cst_30 : f32 to vector<8x128xf32>
    %65 = vector.broadcast %cst_31 : f32 to vector<8x128xf32>
    %66 = arith.select %63, %64, %65 : vector<8x128xi1>, vector<8x128xf32>
    %cst_32 = arith.constant dense<0.000000e+00> : vector<8x192xf32>
    %67 = tpu.matmul %66, %56, %cst_32 {dimension_numbers = #tpu.dot_dimension_numbers<[1], [0], [0], [1], [0, 0, 1, 1], [], []>} : vector<8x128xf32>, vector<128x192xf32>, vector<8x192xf32> -> vector<8x192xf32>
    %c160 = arith.constant 160 : index
    %c0_33 = arith.constant 0 : index
    %68 = vector.load %arg2[%c160, %c0_33] : memref<360x96xf32, #tpu.memory_space<vmem>>, vector<192x32xf32>
    %c354 = arith.constant 354 : index
    %c0_34 = arith.constant 0 : index
    %69 = vector.load %arg2[%c354, %c0_34] : memref<360x96xf32, #tpu.memory_space<vmem>>, vector<1x32xf32>
    %cst_35 = arith.constant dense<0.000000e+00> : vector<8x32xf32>
    %70 = tpu.matmul %67, %68, %cst_35 {dimension_numbers = #tpu.dot_dimension_numbers<[1], [0], [0], [1], [0, 0, 1, 1], [], []>} : vector<8x192xf32>, vector<192x32xf32>, vector<8x32xf32> -> vector<8x32xf32>
    %71 = vector.broadcast %69 : vector<1x32xf32> to vector<8x32xf32>
    %72 = arith.addf %70, %71 : vector<8x32xf32>
    %cst_36 = arith.constant 0.000000e+00 : f32
    %73 = vector.broadcast %cst_36 : f32 to vector<8x32xf32>
    %74 = arith.maximumf %72, %73 : vector<8x32xf32>
    %c128 = arith.constant 128 : index
    %c0_37 = arith.constant 0 : index
    %75 = vector.load %arg2[%c128, %c0_37] : memref<360x96xf32, #tpu.memory_space<vmem>>, vector<32x8xf32>
    %c355 = arith.constant 355 : index
    %c0_38 = arith.constant 0 : index
    %76 = vector.load %arg2[%c355, %c0_38] : memref<360x96xf32, #tpu.memory_space<vmem>>, vector<1x8xf32>
    %cst_39 = arith.constant dense<0.000000e+00> : vector<8x8xf32>
    %77 = tpu.matmul %74, %75, %cst_39 {dimension_numbers = #tpu.dot_dimension_numbers<[1], [0], [0], [1], [0, 0, 1, 1], [], []>} : vector<8x32xf32>, vector<32x8xf32>, vector<8x8xf32> -> vector<8x8xf32>
    %78 = vector.broadcast %76 : vector<1x8xf32> to vector<8x8xf32>
    %79 = arith.addf %77, %78 : vector<8x8xf32>
    %80 = arith.negf %79 : vector<8x8xf32>
    %81 = math.exp %80 : vector<8x8xf32>
    %cst_40 = arith.constant 1.000000e+00 : f32
    %82 = vector.broadcast %cst_40 : f32 to vector<8x8xf32>
    %83 = arith.addf %82, %81 : vector<8x8xf32>
    %84 = arith.divf %82, %83 : vector<8x8xf32>
    %c356 = arith.constant 356 : index
    %c0_41 = arith.constant 0 : index
    %85 = vector.load %arg2[%c356, %c0_41] : memref<360x96xf32, #tpu.memory_space<vmem>>, vector<1x8xf32>
    %86 = vector.broadcast %85 : vector<1x8xf32> to vector<8x8xf32>
    %87 = arith.mulf %84, %86 : vector<8x8xf32>
    %cst_42 = arith.constant 0.000000e+00 : f32
    %88 = vector.broadcast %cst_42 : f32 to vector<128x32xf32>
    %89 = vector.extract_strided_slice %87 {offsets = [0, 0], sizes = [1, 1], strides = [1, 1]} : vector<8x8xf32> to vector<1x1xf32>
    %90 = vector.extract_strided_slice %56 {offsets = [0, 0], sizes = [128, 32], strides = [1, 1]} : vector<128x192xf32> to vector<128x32xf32>
    %91 = vector.broadcast %89 : vector<1x1xf32> to vector<128x32xf32>
    %92 = arith.mulf %91, %90 : vector<128x32xf32>
    %93 = arith.addf %88, %92 : vector<128x32xf32>
    %94 = vector.extract_strided_slice %87 {offsets = [0, 1], sizes = [1, 1], strides = [1, 1]} : vector<8x8xf32> to vector<1x1xf32>
    %95 = vector.extract_strided_slice %56 {offsets = [0, 32], sizes = [128, 32], strides = [1, 1]} : vector<128x192xf32> to vector<128x32xf32>
    %96 = vector.broadcast %94 : vector<1x1xf32> to vector<128x32xf32>
    %97 = arith.mulf %96, %95 : vector<128x32xf32>
    %98 = arith.addf %93, %97 : vector<128x32xf32>
    %99 = vector.extract_strided_slice %87 {offsets = [0, 2], sizes = [1, 1], strides = [1, 1]} : vector<8x8xf32> to vector<1x1xf32>
    %100 = vector.extract_strided_slice %56 {offsets = [0, 64], sizes = [128, 32], strides = [1, 1]} : vector<128x192xf32> to vector<128x32xf32>
    %101 = vector.broadcast %99 : vector<1x1xf32> to vector<128x32xf32>
    %102 = arith.mulf %101, %100 : vector<128x32xf32>
    %103 = arith.addf %98, %102 : vector<128x32xf32>
    %104 = vector.extract_strided_slice %87 {offsets = [0, 3], sizes = [1, 1], strides = [1, 1]} : vector<8x8xf32> to vector<1x1xf32>
    %105 = vector.extract_strided_slice %56 {offsets = [0, 96], sizes = [128, 32], strides = [1, 1]} : vector<128x192xf32> to vector<128x32xf32>
    %106 = vector.broadcast %104 : vector<1x1xf32> to vector<128x32xf32>
    %107 = arith.mulf %106, %105 : vector<128x32xf32>
    %108 = arith.addf %103, %107 : vector<128x32xf32>
    %109 = vector.extract_strided_slice %87 {offsets = [0, 4], sizes = [1, 1], strides = [1, 1]} : vector<8x8xf32> to vector<1x1xf32>
    %110 = vector.extract_strided_slice %56 {offsets = [0, 128], sizes = [128, 32], strides = [1, 1]} : vector<128x192xf32> to vector<128x32xf32>
    %111 = vector.broadcast %109 : vector<1x1xf32> to vector<128x32xf32>
    %112 = arith.mulf %111, %110 : vector<128x32xf32>
    %113 = arith.addf %108, %112 : vector<128x32xf32>
    %114 = vector.extract_strided_slice %87 {offsets = [0, 5], sizes = [1, 1], strides = [1, 1]} : vector<8x8xf32> to vector<1x1xf32>
    %115 = vector.extract_strided_slice %56 {offsets = [0, 160], sizes = [128, 32], strides = [1, 1]} : vector<128x192xf32> to vector<128x32xf32>
    %116 = vector.broadcast %114 : vector<1x1xf32> to vector<128x32xf32>
    %117 = arith.mulf %116, %115 : vector<128x32xf32>
    %118 = arith.addf %113, %117 : vector<128x32xf32>
    %c357 = arith.constant 357 : index
    %c0_43 = arith.constant 0 : index
    %119 = vector.load %arg2[%c357, %c0_43] : memref<360x96xf32, #tpu.memory_space<vmem>>, vector<1x1xf32>
    %120 = vector.broadcast %119 : vector<1x1xf32> to vector<128x32xf32>
    %121 = arith.addf %118, %120 : vector<128x32xf32>
    %c0_44 = arith.constant 0 : index
    %c0_45 = arith.constant 0 : index
    %122 = vector.load %arg3[%c0_44, %c0_45] : memref<128x32xf32, #tpu.memory_space<vmem>>, vector<128x32xf32>
    tpu.vector_store %arg3[%c0_44, %c0_45], %121 {strides = array<i32>} : memref<128x32xf32, #tpu.memory_space<vmem>>, vector<128x32xf32>,
    return
  }
}

</mosaic_0001>

<bundles_post_ra>
// kernel: fused_forward.1
= control target key start
LH: loop header
LB: loop body
LE: loop exit
PB: predicated region body
PF: predicated region fallthrough
CT: control target
= control target key end

     0   :  { %vm36_vm0 = vcmask 261120   ;;  %s4336_s7 = smov 96   ;;  %s4337_s14 = smov 64   ;;  %vm2227_vm1 = vcmask 523264   ;;  %vm2244_vm2 = vcmask 785408   ;;  %vm4342_vm6 = vmmov 0   ;;  %s6125_s2 = inlined_call_operand.vmem [shape: f32[360,96], index: 2, kind: input, shape index: {}]   ;;  %s6126_s1 = inlined_call_operand.vmem [shape: f32[128,32], index: 1, kind: input, shape index: {}]   ;;  %s6127_s0 = inlined_call_operand.vmem [shape: f32[3,128,128], index: 0, kind: input, shape index: {}]   ;;  %s6128_s3 = inlined_call_operand.vmem [shape: f32[128,32], index: 3, kind: output, shape index: {}]  }
   0x1   :  { %v30_v0 = vld [vmem:[%s6125_s2] sm:$0xff]  ;;  %v31_v1 = vld [vmem:[%s6125_s2 + $0x8] sm:$0xff]  ;;  %v32_v2 = vld [vmem:[%s6125_s2 + $0x10] sm:$0xff]  ;;  %s4338_s10 = smov 32   ;;  %s4343_s29 = smov 126  }
   0x2   :  { %v3928_v3 = vpack.c.bf16 %v31_v1, %v30_v0  ;;  %v33_v4 = vld [vmem:[%s6125_s2 + $0x18] sm:$0xff]  ;;  %v14_v5 = vld [vmem:[%s6126_s1] sm:$0xff]  ;;  %v15_v7 = vld [vmem:[%s6126_s1 + $0x8] sm:$0xff]  ;;  %s4344_s30 = smov 127   ;;  %s4346_s4 = smov 125  }
   0x3   :  { %v3932_v6 = vpack.c.bf16 %v33_v4, %v32_v2  ;;  %3461 = vmatprep.mubr.msk.f32.mxu0 %vm36_vm0, %v14_v5  ;;  %v16_v8 = vld [vmem:[%s6126_s1 + $0x10] sm:$0xff]  ;;  %v17_v9 = vld [vmem:[%s6126_s1 + $0x18] sm:$0xff]  ;;  %v18_v10 = vld [vmem:[%s6126_s1 + $0x20] sm:$0xff]  ;;  %s4347_s5 = smov 123  }
   0x4   :  { %3929 = vmatprep.subr.bf16.mxu0 %v3928_v3  ;;  %v19_v11 = vld [vmem:[%s6126_s1 + $0x28] sm:$0xff]  ;;  %v20_v12 = vld [vmem:[%s6126_s1 + $0x30] sm:$0xff]  ;;  %v21_v13 = vld [vmem:[%s6126_s1 + $0x38] sm:$0xff] }
   0x5   :  { %3931 = vmatpush3.bf16.msra.mxu0 %v3928_v3  ;;  %v22_v14 = vld [vmem:[%s6126_s1 + $0x40] sm:$0xff]  ;;  %v23_v15 = vld [vmem:[%s6126_s1 + $0x48] sm:$0xff]  ;;  %v24_v16 = vld [vmem:[%s6126_s1 + $0x50] sm:$0xff] }
   0x6   :  { %3933 = vmatprep.subr.bf16.mxu0 %v3932_v6  ;;  %v25_v17 = vld [vmem:[%s6126_s1 + $0x58] sm:$0xff]  ;;  %v26_v18 = vld [vmem:[%s6126_s1 + $0x60] sm:$0xff]  ;;  %v27_v19 = vld [vmem:[%s6126_s1 + $0x68] sm:$0xff] }
   0x7   :  { %v28_v20 = vld [vmem:[%s6126_s1 + $0x70] sm:$0xff]  ;;  %v29_v21 = vld [vmem:[%s6126_s1 + $0x78] sm:$0xff]  ;;  %v4447_v22 = vld [vmem:[%s6127_s0] sm:$0xff]  ;;  %s4345_s1 = smov 124  }
   0x8   :  { %3517 = vmatprep.mubr.f32.mxu1 %v4447_v22  ;;  %v411_v23 = vld [vmem:[%s6125_s2 + $0x20] sm:$0xff]  ;;  %v412_v24 = vld [vmem:[%s6125_s2 + $0x28] sm:$0xff]  ;;  %v413_v26 = vld [vmem:[%s6125_s2 + $0x30] sm:$0xff] }
   0x9   :  { %3935 = vmatpush3.bf16.msra.mxu0 %v3932_v6  ;;  %v3968_v25 = vpack.c.bf16 %v412_v24, %v411_v23  ;;  %v414_v27 = vld [vmem:[%s6125_s2 + $0x38] sm:$0xff]  ;;  %v4472_v59 = vld [vmem:[%s6125_s2 + $0x160] ss:$0 sm:$0xff]  ;;  %v4480_v62 = vld [vmem:[%s6127_s0 + $0x8] sm:$0xff] }
   0xa   :  { %v3972_v28 = vpack.c.bf16 %v414_v27, %v413_v26  ;;  %v4485_v63 = vld [vmem:[%s6127_s0 + $0x10] sm:$0xff]  ;;  %v4494_v0 = vld [vmem:[%s6127_s0 + $0x18] sm:$0xff]  ;;  %v4499_v1 = vld [vmem:[%s6127_s0 + $0x20] sm:$0xff] }
   0xb   :  { %3969 = vmatprep.subr.bf16.mxu0 %v3968_v25  ;;  %v4508_v2 = vld [vmem:[%s6127_s0 + $0x28] sm:$0xff]  ;;  %v4513_v3 = vld [vmem:[%s6127_s0 + $0x30] sm:$0xff]  ;;  %v4522_v4 = vld [vmem:[%s6127_s0 + $0x38] sm:$0xff] }
   0xc   :  { %3462 = vmatmul.mubr.msk.f32.vlgmr.msra.gmra.mrb[0].mxu0 %vm36_vm0, %v15_v7  ;;  %v4527_v5 = vld [vmem:[%s6127_s0 + $0x40] sm:$0xff]  ;;  %v4536_v6 = vld [vmem:[%s6127_s0 + $0x48] sm:$0xff]  ;;  %v4541_v7 = vld [vmem:[%s6127_s0 + $0x50] sm:$0xff] }
   0xd   :  { %3464 = vmatprep.mubr.msk.f32.mxu0 %vm36_vm0, %v16_v8  ;;  %3971 = vmatpush3.bf16.msra.mxu0 %v3968_v25  ;;  %v4550_v8 = vld [vmem:[%s6127_s0 + $0x58] sm:$0xff] }
   0xe   :  { %3973 = vmatprep.subr.bf16.mxu0 %v3972_v28 }
  0x10   :  { %3465 = vmatmul.mubr.msk.f32.gmra.mrb[2].mxu0 %vm36_vm0, %v17_v9  ;;  %v4555_v9 = vld [vmem:[%s6127_s0 + $0x60] sm:$0xff] }
  0x11   :  { %3467 = vmatprep.mubr.msk.f32.mxu0 %vm36_vm0, %v18_v10  ;;  %3975 = vmatpush3.bf16.msra.mxu0 %v3972_v28  ;;  %v4562_v10 = vld [vmem:[%s6127_s0 + $0x68] sm:$0xff] }
  0x14   :  { %3468 = vmatmul.mubr.msk.f32.gmra.mrb[4].mxu0 %vm36_vm0, %v19_v11  ;;  %v4567_v11 = vld [vmem:[%s6127_s0 + $0x70] sm:$0xff] }
  0x15   :  { %3470 = vmatprep.mubr.msk.f32.mxu0 %vm36_vm0, %v20_v12  ;;  %v4574_v12 = vld [vmem:[%s6127_s0 + $0x78] sm:$0xff] }
  0x18   :  { %3471 = vmatmul.mubr.msk.f32.gmra.mrb[6].mxu0 %vm36_vm0, %v21_v13 }
  0x19   :  { %3473 = vmatprep.mubr.msk.f32.mxu0 %vm36_vm0, %v22_v14 }
  0x1c   :  { %3474 = vmatmul.mubr.msk.f32.gmra.mrb[8].mxu0 %vm36_vm0, %v23_v15 }
  0x1d   :  { %3476 = vmatprep.mubr.msk.f32.mxu0 %vm36_vm0, %v24_v16 }
  0x20   :  { %3477 = vmatmul.mubr.msk.f32.gmra.mrb[10].mxu0 %vm36_vm0, %v25_v17 }
  0x21   :  { %3479 = vmatprep.mubr.msk.f32.mxu0 %vm36_vm0, %v26_v18 }
  0x24   :  { %3480 = vmatmul.mubr.msk.f32.gmra.mrb[12].mxu0 %vm36_vm0, %v27_v19 }
  0x25   :  { %3482 = vmatprep.mubr.msk.f32.mxu0 %vm36_vm0, %v28_v20 }
  0x28   :  { %3483 = vmatmul.mubr.msk.f32.gmra.mrb[14].mxu0 %vm36_vm0, %v29_v21 }
  0xdf   :  { %v3463_v29 = vpop.f32.mrb[0].mxu0 }
  0xe0   :  { %v151_v30 = vpop.f32.mrb[1].mxu0 }
  0xe1   :  { %v4292_v31 = vpack.i.bf16 %v3463_v29, %v151_v30  ;;  %v3936_v32 = vpack.c.bf16 %v3463_v29, %v151_v30 }
  0xe3   :  { %4253 = vrot.lane.b32.xlu0 %v4292_v31, %s4336_s7  ;;  %v3466_v33 = vpop.f32.mrb[2].mxu0  ;;  %3937 = vmatprep.subr.bf16.mxu1 %v3936_v32 }
  0xe4   :  { %v161_v34 = vpop.f32.mrb[3].mxu0  ;;  %3939 = vmatpush3.bf16.msra.mxu1 %v3936_v32 }
  0xe5   :  { %v4297_v35 = vpack.i.bf16 %v3466_v33, %v161_v34  ;;  %v3940_v36 = vpack.c.bf16 %v3466_v33, %v161_v34 }
  0xe7   :  { %4258 = vrot.lane.b32.xlu0 %v4297_v35, %s4336_s7  ;;  %v3469_v37 = vpop.f32.mrb[4].mxu0  ;;  %3941 = vmatprep.subr.bf16.mxu1 %v3940_v36 }
  0xe8   :  { %v171_v38 = vpop.f32.mrb[5].mxu0  ;;  %3943 = vmatpush3.bf16.msra.mxu1 %v3940_v36 }
  0xe9   :  { %v4302_v39 = vpack.i.bf16 %v3469_v37, %v171_v38  ;;  %v3944_v40 = vpack.c.bf16 %v3469_v37, %v171_v38 }
  0xeb   :  { %4263 = vrot.lane.b32.xlu1 %v4302_v39, %s4336_s7  ;;  %v3472_v41 = vpop.f32.mrb[6].mxu0  ;;  %3945 = vmatprep.subr.bf16.mxu1 %v3944_v40 }
  0xec   :  { %v181_v42 = vpop.f32.mrb[7].mxu0  ;;  %3947 = vmatpush3.bf16.msra.mxu1 %v3944_v40 }
  0xed   :  { %v4307_v43 = vpack.i.bf16 %v3472_v41, %v181_v42  ;;  %v3948_v44 = vpack.c.bf16 %v3472_v41, %v181_v42 }
  0xef   :  { %4268 = vrot.lane.b32.xlu1 %v4307_v43, %s4336_s7  ;;  %v3475_v45 = vpop.f32.mrb[8].mxu0  ;;  %3949 = vmatprep.subr.bf16.mxu1 %v3948_v44 }
  0xf0   :  { %v191_v46 = vpop.f32.mrb[9].mxu0  ;;  %3951 = vmatpush3.bf16.msra.mxu1 %v3948_v44 }
  0xf1   :  { %v4312_v47 = vpack.i.bf16 %v3475_v45, %v191_v46  ;;  %v3952_v48 = vpack.c.bf16 %v3475_v45, %v191_v46 }
  0xf3   :  { %4273 = vrot.lane.b32.xlu0 %v4312_v47, %s4336_s7  ;;  %v3478_v49 = vpop.f32.mrb[10].mxu0  ;;  %3953 = vmatprep.subr.bf16.mxu1 %v3952_v48 }
  0xf4   :  { %v201_v50 = vpop.f32.mrb[11].mxu0  ;;  %3955 = vmatpush3.bf16.msra.mxu1 %v3952_v48 }
  0xf5   :  { %v4317_v51 = vpack.i.bf16 %v3478_v49, %v201_v50  ;;  %v3956_v52 = vpack.c.bf16 %v3478_v49, %v201_v50 }
  0xf7   :  { %4278 = vrot.lane.b32.xlu1 %v4317_v51, %s4336_s7  ;;  %v3481_v53 = vpop.f32.mrb[12].mxu0  ;;  %3957 = vmatprep.subr.bf16.mxu1 %v3956_v52 }
  0xf8   :  { %v211_v54 = vpop.f32.mrb[13].mxu0  ;;  %3959 = vmatpush3.bf16.msra.mxu1 %v3956_v52 }
  0xf9   :  { %v4322_v55 = vpack.i.bf16 %v3481_v53, %v211_v54  ;;  %v3960_v56 = vpack.c.bf16 %v3481_v53, %v211_v54 }
  0xfb   :  { %4283 = vrot.lane.b32.xlu0 %v4322_v55, %s4336_s7  ;;  %v3484_v57 = vpop.f32.mrb[14].mxu0  ;;  %3961 = vmatprep.subr.bf16.mxu1 %v3960_v56 }
  0xfc   :  { %v221_v58 = vpop.f32.mrb[15].mxu0  ;;  %3963 = vmatpush3.bf16.msra.mxu1 %v3960_v56 }
  0xfd   :  { %v4327_v60 = vpack.i.bf16 %v3484_v57, %v221_v58  ;;  %v3964_v61 = vpack.c.bf16 %v3484_v57, %v221_v58 }
  0xff   :  { %855 = vrot.lane.b32.xlu0 %v4472_v59, %s4336_s7  ;;  %4288 = vrot.lane.b32.xlu1 %v4327_v60, %s4336_s7 }
 0x100   :  { %3965 = vmatprep.subr.bf16.mxu1 %v3964_v61 }
 0x101   :  { %3967 = vmatpush3.bf16.msra.mxu1 %v3964_v61 }
 0x103   :  { %4298 = vrot.lane.b32.xlu0 %v4297_v35, %s4337_s14  ;;  %4293 = vrot.lane.b32.xlu1 %v4292_v31, %s4337_s14 }
 0x104   :  { %3518 = vmatmul.mubr.f32.vlgmr.msra.gmra.mrb[0].mxu1 %v4480_v62 }
 0x105   :  { %3520 = vmatprep.mubr.f32.mxu1 %v4485_v63 }
 0x107   :  { %4308 = vrot.lane.b32.xlu0 %v4307_v43, %s4337_s14  ;;  %4303 = vrot.lane.b32.xlu1 %v4302_v39, %s4337_s14 }
 0x108   :  { %3521 = vmatmul.mubr.f32.gmra.mrb[2].mxu1 %v4494_v0 }
 0x109   :  { %3523 = vmatprep.mubr.f32.mxu1 %v4499_v1 }
 0x10b   :  { %4318 = vrot.lane.b32.xlu0 %v4317_v51, %s4337_s14  ;;  %4313 = vrot.lane.b32.xlu1 %v4312_v47, %s4337_s14 }
 0x10c   :  { %3524 = vmatmul.mubr.f32.gmra.mrb[4].mxu1 %v4508_v2 }
 0x10d   :  { %3526 = vmatprep.mubr.f32.mxu1 %v4513_v3 }
 0x10f   :  { %4328 = vrot.lane.b32.xlu0 %v4327_v60, %s4337_s14  ;;  %4323 = vrot.lane.b32.xlu1 %v4322_v55, %s4337_s14 }
 0x110   :  { %3527 = vmatmul.mubr.f32.gmra.mrb[6].mxu1 %v4522_v4 }
 0x111   :  { %3529 = vmatprep.mubr.f32.mxu1 %v4527_v5 }
 0x113   :  { %1446 = vrot.lane.b32.xlu1 %v4472_v59, %s4337_s14 }
 0x114   :  { %3530 = vmatmul.mubr.f32.gmra.mrb[8].mxu1 %v4536_v6 }
 0x115   :  { %3532 = vmatprep.mubr.f32.mxu1 %v4541_v7 }
 0x118   :  { %3533 = vmatmul.mubr.f32.gmra.mrb[10].mxu1 %v4550_v8 }
 0x119   :  { %3535 = vmatprep.mubr.f32.mxu1 %v4555_v9 }
 0x11c   :  { %3536 = vmatmul.mubr.f32.gmra.mrb[12].mxu1 %v4562_v10 }
 0x11d   :  { %3538 = vmatprep.mubr.f32.mxu1 %v4567_v11 }
 0x120   :  { %3539 = vmatmul.mubr.f32.gmra.mrb[14].mxu1 %v4574_v12 }
 0x121   :  { %3605 = vmatprep.mubr.f32.mxu1 %v4447_v22 }
 0x155   :  { %v4254_v13 = vpop.permute.xlu0 %4253 }
 0x156   :  { %v4256_v14 = vunpack.i.h.bf16 %v4254_v13  ;;  %v4255_v15 = vunpack.i.l.bf16 %v4254_v13 }
 0x158   :  { %v4008_v16 = vpack.c.bf16 %v4256_v14, %v4255_v15 }
 0x159   :  { %v4259_v17 = vpop.permute.xlu0 %4258 }
 0x15a   :  { %4009 = vmatprep.subr.bf16.mxu0 %v4008_v16  ;;  %v4261_v24 = vunpack.i.h.bf16 %v4259_v17  ;;  %v4260_v25 = vunpack.i.l.bf16 %v4259_v17 }
 0x15c   :  { %v4012_v33 = vpack.c.bf16 %v4261_v24, %v4260_v25 }
 0x15d   :  { %v4264_v21 = vpop.permute.xlu1 %4263 }
 0x15e   :  { %v4266_v31 = vunpack.i.h.bf16 %v4264_v21  ;;  %v4265_v32 = vunpack.i.l.bf16 %v4264_v21 }
 0x160   :  { %v4016_v43 = vpack.c.bf16 %v4266_v31, %v4265_v32 }
 0x161   :  { %v4269_v34 = vpop.permute.xlu1 %4268 }
 0x162   :  { %v4271_v41 = vunpack.i.h.bf16 %v4269_v34  ;;  %v4270_v42 = vunpack.i.l.bf16 %v4269_v34 }
 0x164   :  { %v4020_v53 = vpack.c.bf16 %v4271_v41, %v4270_v42 }
 0x165   :  { %v4274_v44 = vpop.permute.xlu0 %4273 }
 0x166   :  { %v4276_v51 = vunpack.i.h.bf16 %v4274_v44  ;;  %v4275_v52 = vunpack.i.l.bf16 %v4274_v44 }
 0x168   :  { %v4024_v15 = vpack.c.bf16 %v4276_v51, %v4275_v52 }
 0x169   :  { %v4279_v54 = vpop.permute.xlu1 %4278 }
 0x16a   :  { %v4281_v13 = vunpack.i.h.bf16 %v4279_v54  ;;  %v4280_v14 = vunpack.i.l.bf16 %v4279_v54 }
 0x16c   :  { %v4028_v31 = vpack.c.bf16 %v4281_v13, %v4280_v14 }
 0x171   :  { %v4289_v32 = vpop.permute.xlu1 %4288 }
 0x172   :  { %v4290_v44 = vunpack.i.l.bf16 %v4289_v32 }
 0x1d7   :  { %v3519_v18 = vpop.f32.mrb[0].mxu1 }
 0x1d8   :  { %v4579_v19 = vadd.f32 %v3519_v18, %v4472_v59  ;;  %v316_v20 = vpop.f32.mrb[1].mxu1 }
 0x1d9   :  { %v4582_v23 = vadd.f32 %v4472_v59, %v316_v20 }
 0x1da   :  { %v6144_v27 = vmax.f32 %v4579_v19, 0.0 }
 0x1db   :  { %v6143_v26 = vmax.f32 %v4582_v23, 0.0  ;;  %v3522_v22 = vpop.f32.mrb[2].mxu1 }
 0x1dc   :  { %v4587_v28 = vadd.f32 %v3522_v22, %v4472_v59  ;;  %v326_v29 = vpop.f32.mrb[3].mxu1 }
 0x1dd   :  { %v4590_v30 = vadd.f32 %v4472_v59, %v326_v29  ;;  %3549 = vmatprep.mubr.msk.f32.mxu0 %vm36_vm0, %v6143_v26 }
 0x1de   :  { %3550 = vmatmul.mubr.msk.f32.vlgmr.msra.gmra.mrb[16].mxu0 %vm36_vm0, %v6144_v27  ;;  %v6142_v37 = vmax.f32 %v4587_v28, 0.0 }
 0x1df   :  { %v6141_v35 = vmax.f32 %v4590_v30, 0.0  ;;  %4011 = vmatpush3.bf16.msra.mxu0 %v4008_v16  ;;  %v3525_v36 = vpop.f32.mrb[4].mxu1  ;;  %v4284_v16 = vpop.permute.xlu0 %4283 }
 0x1e0   :  { %v4601_v38 = vadd.f32 %v3525_v36, %v4472_v59  ;;  %4013 = vmatprep.subr.bf16.mxu0 %v4012_v33  ;;  %v336_v39 = vpop.f32.mrb[5].mxu1  ;;  %v4286_v22 = vunpack.i.h.bf16 %v4284_v16  ;;  %v4285_v29 = vunpack.i.l.bf16 %v4284_v16  ;;  %v4701_v16 = vld [vmem:[%s6127_s0 + $0x90] sm:$0xff] }
 0x1e1   :  { %v4604_v40 = vadd.f32 %v4472_v59, %v336_v39  ;;  %3552 = vmatprep.mubr.msk.f32.mxu0 %vm36_vm0, %v6141_v35 }
 0x1e2   :  { %3553 = vmatmul.mubr.msk.f32.gmra.mrb[18].mxu0 %vm36_vm0, %v6142_v37  ;;  %v6140_v47 = vmax.f32 %v4601_v38, 0.0 }
 0x1e3   :  { %v6139_v45 = vmax.f32 %v4604_v40, 0.0  ;;  %4015 = vmatpush3.bf16.msra.mxu0 %v4012_v33  ;;  %v3528_v46 = vpop.f32.mrb[6].mxu1 }
 0x1e4   :  { %v4615_v48 = vadd.f32 %v3528_v46, %v4472_v59  ;;  %4017 = vmatprep.subr.bf16.mxu0 %v4016_v43  ;;  %v346_v49 = vpop.f32.mrb[7].mxu1  ;;  %v4032_v46 = vpack.c.bf16 %v4286_v22, %v4285_v29  ;;  %v4720_v22 = vld [vmem:[%s6127_s0 + $0xa8] sm:$0xff]  ;;  %v4725_v29 = vld [vmem:[%s6127_s0 + $0xb0] sm:$0xff] }
 0x1e5   :  { %v4618_v50 = vadd.f32 %v4472_v59, %v346_v49  ;;  %3555 = vmatprep.mubr.msk.f32.mxu0 %vm36_vm0, %v6139_v45 }
 0x1e6   :  { %3556 = vmatmul.mubr.msk.f32.gmra.mrb[20].mxu0 %vm36_vm0, %v6140_v47  ;;  %v6138_v57 = vmax.f32 %v4615_v48, 0.0 }
 0x1e7   :  { %v6137_v55 = vmax.f32 %v4618_v50, 0.0  ;;  %4019 = vmatpush3.bf16.msra.mxu0 %v4016_v43  ;;  %v3531_v56 = vpop.f32.mrb[8].mxu1  ;;  %v4291_v43 = vunpack.i.h.bf16 %v4289_v32  ;;  %v4737_v32 = vld [vmem:[%s6127_s0 + $0xc0] sm:$0xff] }
 0x1e8   :  { %v4629_v58 = vadd.f32 %v3531_v56, %v4472_v59  ;;  %4021 = vmatprep.subr.bf16.mxu0 %v4020_v53  ;;  %v356_v60 = vpop.f32.mrb[9].mxu1 }
 0x1e9   :  { %v4632_v61 = vadd.f32 %v4472_v59, %v356_v60  ;;  %3558 = vmatprep.mubr.msk.f32.mxu0 %vm36_vm0, %v6137_v55  ;;  %v4036_v60 = vpack.c.bf16 %v4291_v43, %v4290_v44  ;;  %v4756_v43 = vld [vmem:[%s6127_s0 + $0xd8] sm:$0xff]  ;;  %v4761_v44 = vld [vmem:[%s6127_s0 + $0xe0] sm:$0xff] }
 0x1ea   :  { %3559 = vmatmul.mubr.msk.f32.gmra.mrb[22].mxu0 %vm36_vm0, %v6138_v57  ;;  %v6136_v20 = vmax.f32 %v4629_v58, 0.0 }
 0x1eb   :  { %v6135_v17 = vmax.f32 %v4632_v61, 0.0  ;;  %4023 = vmatpush3.bf16.msra.mxu0 %v4020_v53  ;;  %v3534_v18 = vpop.f32.mrb[10].mxu1 }
 0x1ec   :  { %v4643_v21 = vadd.f32 %v3534_v18, %v4472_v59  ;;  %4025 = vmatprep.subr.bf16.mxu0 %v4024_v15  ;;  %v366_v24 = vpop.f32.mrb[11].mxu1  ;;  %v4708_v18 = vld [vmem:[%s6127_s0 + $0x98] sm:$0xff] }
 0x1ed   :  { %v4646_v25 = vadd.f32 %v4472_v59, %v366_v24  ;;  %3561 = vmatprep.mubr.msk.f32.mxu0 %vm36_vm0, %v6135_v17  ;;  %v4713_v24 = vld [vmem:[%s6127_s0 + $0xa0] sm:$0xff] }
 0x1ee   :  { %3562 = vmatmul.mubr.msk.f32.gmra.mrb[24].mxu0 %vm36_vm0, %v6136_v20  ;;  %v6134_v36 = vmax.f32 %v4643_v21, 0.0 }
 0x1ef   :  { %v6133_v33 = vmax.f32 %v4646_v25, 0.0  ;;  %4027 = vmatpush3.bf16.msra.mxu0 %v4024_v15  ;;  %v3537_v34 = vpop.f32.mrb[12].mxu1  ;;  %v4696_v15 = vld [vmem:[%s6127_s0 + $0x88] sm:$0xff] }
 0x1f0   :  { %v4657_v39 = vadd.f32 %v3537_v34, %v4472_v59  ;;  %4029 = vmatprep.subr.bf16.mxu0 %v4028_v31  ;;  %v376_v41 = vpop.f32.mrb[13].mxu1  ;;  %v4744_v34 = vld [vmem:[%s6127_s0 + $0xc8] sm:$0xff] }
 0x1f1   :  { %v4660_v42 = vadd.f32 %v4472_v59, %v376_v41  ;;  %3564 = vmatprep.mubr.msk.f32.mxu0 %vm36_vm0, %v6133_v33  ;;  %v4749_v41 = vld [vmem:[%s6127_s0 + $0xd0] sm:$0xff] }
 0x1f2   :  { %3565 = vmatmul.mubr.msk.f32.gmra.mrb[26].mxu0 %vm36_vm0, %v6134_v36  ;;  %v6132_v52 = vmax.f32 %v4657_v39, 0.0 }
 0x1f3   :  { %6188 = vst [vmem:[#allocation2_spill] sm:$0xff] %v4660_v42  ;;  %v6131_v49 = vmax.f32 %v4660_v42, 0.0  ;;  %4031 = vmatpush3.bf16.msra.mxu0 %v4028_v31  ;;  %v3540_v51 = vpop.f32.mrb[14].mxu1  ;;  %v4732_v31 = vld [vmem:[%s6127_s0 + $0xb8] sm:$0xff] }
 0x1f4   :  { %v4671_v53 = vadd.f32 %v3540_v51, %v4472_v59  ;;  %4033 = vmatprep.subr.bf16.mxu0 %v4032_v46  ;;  %v386_v54 = vpop.f32.mrb[15].mxu1  ;;  %v4773_v51 = vld [vmem:[%s6127_s0 + $0xf0] sm:$0xff] }
 0x1f5   :  { %v4674_v56 = vadd.f32 %v4472_v59, %v386_v54  ;;  %3567 = vmatprep.mubr.msk.f32.mxu0 %vm36_vm0, %v6131_v49  ;;  %v3105_v59 = vld [vmem:[%s6127_s0 + $0x80] sm:$0xff]  ;;  %v4780_v54 = vld [vmem:[%s6127_s0 + $0xf8] sm:$0xff] }
 0x1f6   :  { %6189 = vst [vmem:[#allocation3_spill] sm:$0xff] %v4671_v53  ;;  %3568 = vmatmul.mubr.msk.f32.gmra.mrb[28].mxu0 %vm36_vm0, %v6132_v52  ;;  %v6130_v14 = vmax.f32 %v4671_v53, 0.0 }
 0x1f7   :  { %6190 = vst [vmem:[#allocation4_spill] sm:$0xff] %v4674_v56  ;;  %v6129_v13 = vmax.f32 %v4674_v56, 0.0  ;;  %4035 = vmatpush3.bf16.msra.mxu0 %v4032_v46  ;;  %v4768_v46 = vld [vmem:[%s6127_s0 + $0xe8] sm:$0xff] }
 0x1f8   :  { %4037 = vmatprep.subr.bf16.mxu0 %v4036_v60 }
 0x1f9   :  { %3570 = vmatprep.mubr.msk.f32.mxu0 %vm36_vm0, %v6129_v13 }
 0x1fa   :  { %3571 = vmatmul.mubr.msk.f32.gmra.mrb[30].mxu0 %vm36_vm0, %v6130_v14 }
 0x1fb   :  { %4039 = vmatpush3.bf16.msra.mxu0 %v4036_v60  ;;  %3661 = vmatprep.mubr.f32.mxu0 %v3105_v59  ;;  %v4786_v60 = vld [vmem:[%s6125_s2 + $0x161] ss:$0 sm:$0xff] }
 0x1fc   :  { %1807 = vrot.lane.b32.xlu0 %v4786_v60, %s4337_s14  ;;  %1217 = vrot.lane.b32.xlu1 %v4786_v60, %s4336_s7 }
 0x1fe   :  { %3662 = vmatmul.mubr.f32.vlgmr.msra.gmra.mrb[32].mxu0 %v4696_v15 }
 0x1ff   :  { %3664 = vmatprep.mubr.f32.mxu0 %v4701_v16 }
 0x202   :  { %3665 = vmatmul.mubr.f32.gmra.mrb[34].mxu0 %v4708_v18 }
 0x203   :  { %3667 = vmatprep.mubr.f32.mxu0 %v4713_v24 }
 0x206   :  { %3668 = vmatmul.mubr.f32.gmra.mrb[36].mxu0 %v4720_v22 }
 0x207   :  { %3670 = vmatprep.mubr.f32.mxu0 %v4725_v29 }
 0x20a   :  { %3671 = vmatmul.mubr.f32.gmra.mrb[38].mxu0 %v4732_v31 }
 0x20b   :  { %3673 = vmatprep.mubr.f32.mxu0 %v4737_v32 }
 0x20e   :  { %3674 = vmatmul.mubr.f32.gmra.mrb[40].mxu0 %v4744_v34 }
 0x20f   :  { %3676 = vmatprep.mubr.f32.mxu0 %v4749_v41 }
 0x212   :  { %3677 = vmatmul.mubr.f32.gmra.mrb[42].mxu0 %v4756_v43 }
 0x213   :  { %3679 = vmatprep.mubr.f32.mxu0 %v4761_v44 }
 0x216   :  { %3680 = vmatmul.mubr.f32.gmra.mrb[44].mxu0 %v4768_v46 }
 0x217   :  { %3682 = vmatprep.mubr.f32.mxu0 %v4773_v51 }
 0x21a   :  { %3683 = vmatmul.mubr.f32.gmra.mrb[46].mxu0 %v4780_v54 }
 0x21b   :  { %3749 = vmatprep.mubr.f32.mxu0 %v3105_v59 }
 0x2b1   :  { %v3551_v13 = vpop.f32.mrb[16].mxu0 }
 0x2b2   :  { %v529_v14 = vpop.f32.mrb[17].mxu0 }
 0x2b3   :  { %v3976_v49 = vpack.c.bf16 %v3551_v13, %v529_v14 }
 0x2b5   :  { %v3554_v52 = vpop.f32.mrb[18].mxu0  ;;  %3977 = vmatprep.subr.bf16.mxu1 %v3976_v49 }
 0x2b6   :  { %v539_v33 = vpop.f32.mrb[19].mxu0  ;;  %3979 = vmatpush3.bf16.msra.mxu1 %v3976_v49 }
 0x2b7   :  { %v3980_v36 = vpack.c.bf16 %v3554_v52, %v539_v33 }
 0x2b9   :  { %v3557_v59 = vpop.f32.mrb[20].mxu0  ;;  %3981 = vmatprep.subr.bf16.mxu1 %v3980_v36 }
 0x2ba   :  { %v549_v17 = vpop.f32.mrb[21].mxu0  ;;  %3983 = vmatpush3.bf16.msra.mxu1 %v3980_v36 }
 0x2bb   :  { %v3984_v20 = vpack.c.bf16 %v3557_v59, %v549_v17  ;;  %v1021_v59 = vld [vmem:[%s6125_s2 + $0x50] sm:$0xff] }
 0x2bd   :  { %v3560_v55 = vpop.f32.mrb[22].mxu0  ;;  %3985 = vmatprep.subr.bf16.mxu1 %v3984_v20 }
 0x2be   :  { %v559_v57 = vpop.f32.mrb[23].mxu0  ;;  %3987 = vmatpush3.bf16.msra.mxu1 %v3984_v20  ;;  %v1019_v20 = vld [vmem:[%s6125_s2 + $0x40] sm:$0xff] }
 0x2bf   :  { %v3988_v45 = vpack.c.bf16 %v3560_v55, %v559_v57  ;;  %v1020_v55 = vld [vmem:[%s6125_s2 + $0x48] sm:$0xff] }
 0x2c0   :  { %v4040_v57 = vpack.c.bf16 %v1020_v55, %v1019_v20 }
 0x2c1   :  { %v3563_v47 = vpop.f32.mrb[24].mxu0  ;;  %3989 = vmatprep.subr.bf16.mxu1 %v3988_v45 }
 0x2c2   :  { %v569_v35 = vpop.f32.mrb[25].mxu0  ;;  %3991 = vmatpush3.bf16.msra.mxu1 %v3988_v45 }
 0x2c3   :  { %v3992_v13 = vpack.c.bf16 %v3563_v47, %v569_v35 }
 0x2c5   :  { %v3566_v14 = vpop.f32.mrb[26].mxu0  ;;  %3993 = vmatprep.subr.bf16.mxu1 %v3992_v13 }
 0x2c6   :  { %v579_v37 = vpop.f32.mrb[27].mxu0  ;;  %3995 = vmatpush3.bf16.msra.mxu1 %v3992_v13  ;;  %v1022_v13 = vld [vmem:[%s6125_s2 + $0x58] sm:$0xff] }
 0x2c7   :  { %v3996_v33 = vpack.c.bf16 %v3566_v14, %v579_v37  ;;  %v4798_v37 = vpop.permute.xlu0 %855  ;;  %v4294_v14 = vpop.permute.xlu1 %4293  ;;  %v4044_v20 = vpack.c.bf16 %v1022_v13, %v1021_v59 }
 0x2c8   :  { %v4296_v55 = vunpack.i.h.bf16 %v4294_v14 }
 0x2c9   :  { %v3569_v49 = vpop.f32.mrb[28].mxu0  ;;  %3997 = vmatprep.subr.bf16.mxu1 %v3996_v33 }
 0x2ca   :  { %v589_v52 = vpop.f32.mrb[29].mxu0  ;;  %3999 = vmatpush3.bf16.msra.mxu1 %v3996_v33 }
 0x2cb   :  { %v4000_v17 = vpack.c.bf16 %v3569_v49, %v589_v52 }
 0x2cd   :  { %v3572_v45 = vpop.f32.mrb[30].mxu0  ;;  %4001 = vmatprep.subr.bf16.mxu1 %v4000_v17 }
 0x2ce   :  { %v599_v35 = vpop.f32.mrb[31].mxu0  ;;  %4003 = vmatpush3.bf16.msra.mxu1 %v4000_v17 }
 0x2cf   :  { %v4004_v47 = vpack.c.bf16 %v3572_v45, %v599_v35  ;;  %v4295_v45 = vunpack.i.l.bf16 %v4294_v14 }
 0x2d1   :  { %4005 = vmatprep.subr.bf16.mxu1 %v4004_v47  ;;  %v3663_v36 = vpop.f32.mrb[32].mxu0  ;;  %v4831_v59 = vpack.c.bf16 %v4296_v55, %v4295_v45 }
 0x2d2   :  { %4007 = vmatpush3.bf16.msra.mxu1 %v4004_v47  ;;  %v4807_v33 = vadd.f32 %v3663_v36, %v4798_v37  ;;  %v924_v49 = vpop.f32.mrb[33].mxu0 }
 0x2d3   :  { %v4810_v52 = vadd.f32 %v924_v49, %v4798_v37  ;;  %4041 = vmatprep.subr.bf16.mxu1 %v4040_v57 }
 0x2d4   :  { %v1004_v17 = vmax.f32 %v4807_v33, 0.0 }
 0x2d5   :  { %v1003_v35 = vmax.f32 %v4810_v52, 0.0  ;;  %3606 = vmatmul.mubr.f32.vlgmr.msra.gmra.mrb[16].mxu1 %v4480_v62  ;;  %v3666_v26 = vpop.f32.mrb[34].mxu0 }
 0x2d6   :  { %v4816_v47 = vadd.f32 %v3666_v26, %v4798_v37  ;;  %4043 = vmatpush3.bf16.msra.mxu1 %v4040_v57  ;;  %v934_v36 = vpop.f32.mrb[35].mxu0  ;;  %2037 = vrot.lane.b32.xlu1 %v1004_v17, %s4337_s14 }
 0x2d7   :  { %v4822_v49 = vadd.f32 %v934_v36, %v4798_v37  ;;  %2035 = vrot.lane.b32.xlu0 %v1003_v35, %s4337_s14  ;;  %3608 = vmatprep.mubr.f32.mxu1 %v4485_v63 }
 0x2d8   :  { %v6153_v62 = vmax.f32 %v4816_v47, 0.0  ;;  %4045 = vmatprep.subr.bf16.mxu1 %v4044_v20 }
 0x2d9   :  { %v1005_v26 = vmax.f32 %v4822_v49, 0.0  ;;  %3609 = vmatmul.mubr.f32.gmra.mrb[18].mxu1 %v4494_v0  ;;  %v3669_v57 = vpop.f32.mrb[36].mxu0 }
 0x2da   :  { %v4834_v13 = vadd.f32 %v3669_v57, %v4798_v37  ;;  %4047 = vmatpush3.bf16.msra.mxu1 %v4044_v20  ;;  %v944_v14 = vpop.f32.mrb[37].mxu0  ;;  %2041 = vrot.lane.b32.xlu1 %v6153_v62, %s4337_s14 }
 0x2db   :  { %v4840_v63 = vadd.f32 %v944_v14, %v4798_v37  ;;  %4081 = vmatprep.subr.bf16.mxu1 %v4831_v59  ;;  %2039 = vrot.lane.b32.xlu0 %v1005_v26, %s4337_s14 }
 0x2dc   :  { %v6145_v0 = vmax.f32 %v4834_v13, 0.0  ;;  %3611 = vmatprep.mubr.f32.mxu1 %v4499_v1  ;;  %v6193_v49 = vmax.f32 %v4834_v13, 0.0 }
 0x2dd   :  { %v6150_v20 = vmax.f32 %v4840_v63, 0.0  ;;  %3612 = vmatmul.mubr.f32.gmra.mrb[20].mxu1 %v4508_v2  ;;  %v3672_v55 = vpop.f32.mrb[38].mxu0  ;;  %v6192_v33 = vmax.f32 %v4840_v63, 0.0 }
 0x2de   :  { %v4851_v45 = vadd.f32 %v3672_v55, %v4798_v37  ;;  %v954_v36 = vpop.f32.mrb[39].mxu0  ;;  %2045 = vrot.lane.b32.xlu1 %v6145_v0, %s4337_s14  ;;  %3614 = vmatprep.mubr.f32.mxu1 %v4513_v3 }
 0x2df   :  { %v4858_v57 = vadd.f32 %v954_v36, %v4798_v37  ;;  %2043 = vrot.lane.b32.xlu0 %v6150_v20, %s4337_s14 }
 0x2e0   :  { %v6146_v1 = vmax.f32 %v4851_v45, 0.0  ;;  %v6195_v63 = vmax.f32 %v4851_v45, 0.0 }
 0x2e1   :  { %v6147_v2 = vmax.f32 %v4858_v57, 0.0  ;;  %3615 = vmatmul.mubr.f32.gmra.mrb[22].mxu1 %v4522_v4  ;;  %v3675_v14 = vpop.f32.mrb[40].mxu0 }
 0x2e2   :  { %v4867_v55 = vadd.f32 %v3675_v14, %v4798_v37  ;;  %v964_v27 = vpop.f32.mrb[41].mxu0  ;;  %2049 = vrot.lane.b32.xlu1 %v6146_v1, %s4337_s14  ;;  %3617 = vmatprep.mubr.f32.mxu1 %v4527_v5 }
 0x2e3   :  { %v4874_v3 = vadd.f32 %v964_v27, %v4798_v37  ;;  %2047 = vrot.lane.b32.xlu0 %v6147_v2, %s4337_s14 }
 0x2e4   :  { %v6148_v4 = vmax.f32 %v4867_v55, 0.0 }
 0x2e5   :  { %v6149_v36 = vmax.f32 %v4874_v3, 0.0  ;;  %3618 = vmatmul.mubr.f32.gmra.mrb[24].mxu1 %v4536_v6  ;;  %v3678_v14 = vpop.f32.mrb[42].mxu0  ;;  %v6196_v13 = vmax.f32 %v4874_v3, 0.0 }
 0x2e6   :  { %v4883_v0 = vadd.f32 %v3678_v14, %v4798_v37  ;;  %v974_v1 = vpop.f32.mrb[43].mxu0  ;;  %2053 = vrot.lane.b32.xlu1 %v6148_v4, %s4337_s14  ;;  %3620 = vmatprep.mubr.f32.mxu1 %v4541_v7 }
 0x2e7   :  { %v4890_v5 = vadd.f32 %v974_v1, %v4798_v37  ;;  %2051 = vrot.lane.b32.xlu0 %v6149_v36, %s4337_s14  ;;  %v4299_v36 = vpop.permute.xlu0 %4298 }
 0x2e8   :  { %v6151_v6 = vmax.f32 %v4883_v0, 0.0  ;;  %v6199_v3 = vmax.f32 %v4883_v0, 0.0  ;;  %v3137_v0 = vld [vmem:[%s6127_s0 + $0x100] sm:$0xff] }
 0x2e9   :  { %v6152_v27 = vmax.f32 %v4890_v5, 0.0  ;;  %3621 = vmatmul.mubr.f32.gmra.mrb[26].mxu1 %v4550_v8  ;;  %v3681_v14 = vpop.f32.mrb[44].mxu0  ;;  %v6198_v45 = vmax.f32 %v4890_v5, 0.0  ;;  %v4980_v5 = vld [vmem:[%s6127_s0 + $0x108] sm:$0xff] }
 0x2ea   :  { %v4899_v2 = vadd.f32 %v3681_v14, %v4798_v37  ;;  %v984_v4 = vpop.f32.mrb[45].mxu0  ;;  %2057 = vrot.lane.b32.xlu1 %v6151_v6, %s4337_s14  ;;  %3623 = vmatprep.mubr.f32.mxu1 %v4555_v9 }
 0x2eb   :  { %v4906_v7 = vadd.f32 %v984_v4, %v4798_v37  ;;  %2055 = vrot.lane.b32.xlu0 %v6152_v27, %s4337_s14  ;;  %v4301_v4 = vunpack.i.h.bf16 %v4299_v36  ;;  %v4300_v27 = vunpack.i.l.bf16 %v4299_v36  ;;  %v4309_v36 = vpop.permute.xlu0 %4308 }
 0x2ec   :  { %v1016_v8 = vmax.f32 %v4899_v2, 0.0  ;;  %v4310_v52 = vunpack.i.l.bf16 %v4309_v36  ;;  %v4985_v2 = vld [vmem:[%s6127_s0 + $0x110] sm:$0xff] }
 0x2ed   :  { %v1015_v1 = vmax.f32 %v4906_v7, 0.0  ;;  %3624 = vmatmul.mubr.f32.gmra.mrb[28].mxu1 %v4562_v10  ;;  %v3684_v14 = vpop.f32.mrb[46].mxu0  ;;  %v4997_v7 = vld [vmem:[%s6127_s0 + $0x120] sm:$0xff] }
 0x2ee   :  { %v4915_v20 = vadd.f32 %v3684_v14, %v4798_v37  ;;  %v994_v6 = vpop.f32.mrb[47].mxu0  ;;  %2061 = vrot.lane.b32.xlu1 %v1016_v8, %s4337_s14  ;;  %3626 = vmatprep.mubr.f32.mxu1 %v4567_v11  ;;  %v4304_v14 = vpop.permute.xlu1 %4303 }
 0x2ef   :  { %v995_v9 = vadd.f32 %v994_v6, %v4798_v37  ;;  %2059 = vrot.lane.b32.xlu0 %v1015_v1, %s4337_s14  ;;  %v4306_v11 = vunpack.i.h.bf16 %v4304_v14  ;;  %v4305_v37 = vunpack.i.l.bf16 %v4304_v14 }
 0x2f0   :  { %v1018_v10 = vmax.f32 %v4915_v20, 0.0  ;;  %v4084_v20 = vpack.c.bf16 %v4301_v4, %v4300_v27  ;;  %v4319_v27 = vpop.permute.xlu0 %4318 }
 0x2f1   :  { %v1017_v62 = vmax.f32 %v995_v9, 0.0  ;;  %3627 = vmatmul.mubr.f32.gmra.mrb[30].mxu1 %v4574_v12  ;;  %v4311_v12 = vunpack.i.h.bf16 %v4309_v36  ;;  %v4088_v6 = vpack.c.bf16 %v4306_v11, %v4305_v37  ;;  %v4321_v4 = vunpack.i.h.bf16 %v4319_v27 }
 0x2f2   :  { %3693 = vmatprep.mubr.msk.f32.mxu1 %vm36_vm0, %v1003_v35  ;;  %2065 = vrot.lane.b32.xlu1 %v1018_v10, %s4337_s14  ;;  %v6191_v35 = vmax.f32 %v4816_v47, 0.0  ;;  %v4314_v9 = vpop.permute.xlu1 %4313  ;;  %v6194_v47 = vmax.f32 %v4858_v57, 0.0  ;;  %v4320_v14 = vunpack.i.l.bf16 %v4319_v27  ;;  %v6197_v57 = vmax.f32 %v4867_v55, 0.0  ;;  %v5052_v27 = vld [vmem:[%s6127_s0 + $0x168] sm:$0xff] }
 0x2f3   :  { %2063 = vrot.lane.b32.xlu0 %v1017_v62, %s4337_s14 }
 0x2f5   :  { %3694 = vmatmul.mubr.msk.f32.vlgmr.msra.gmra.mrb[32].mxu1 %vm36_vm0, %v1004_v17  ;;  %v4316_v17 = vunpack.i.h.bf16 %v4314_v9 }
 0x2f6   :  { %4083 = vmatpush3.bf16.msra.mxu1 %v4831_v59  ;;  %3696 = vmatprep.mubr.msk.f32.mxu1 %vm36_vm0, %v1005_v26  ;;  %v4315_v59 = vunpack.i.l.bf16 %v4314_v9  ;;  %v4092_v26 = vpack.c.bf16 %v4311_v12, %v4310_v52  ;;  %v4324_v37 = vpop.permute.xlu1 %4323  ;;  %v4100_v12 = vpack.c.bf16 %v4321_v4, %v4320_v14  ;;  %v4329_v52 = vpop.permute.xlu0 %4328  ;;  %v5064_v4 = vld [vmem:[%s6127_s0 + $0x178] sm:$0xff] }
 0x2f7   :  { %4085 = vmatprep.subr.bf16.mxu1 %v4084_v20  ;;  %v4325_v36 = vunpack.i.l.bf16 %v4324_v37 }
 0x2f8   :  { %v4096_v11 = vpack.c.bf16 %v4316_v17, %v4315_v59  ;;  %v5028_v17 = vld [vmem:[%s6127_s0 + $0x148] sm:$0xff]  ;;  %v5033_v59 = vld [vmem:[%s6127_s0 + $0x150] sm:$0xff] }
 0x2f9   :  { %3697 = vmatmul.mubr.msk.f32.gmra.mrb[34].mxu1 %vm36_vm0, %v6191_v35  ;;  %v4331_v35 = vunpack.i.h.bf16 %v4329_v52 }
 0x2fa   :  { %4087 = vmatpush3.bf16.msra.mxu1 %v4084_v20  ;;  %3699 = vmatprep.mubr.msk.f32.mxu1 %vm36_vm0, %v6192_v33  ;;  %v4326_v20 = vunpack.i.h.bf16 %v4324_v37  ;;  %v5021_v33 = vld [vmem:[%s6127_s0 + $0x140] sm:$0xff] }
 0x2fb   :  { %4089 = vmatprep.subr.bf16.mxu1 %v4088_v6 }
 0x2fc   :  { %v4104_v9 = vpack.c.bf16 %v4326_v20, %v4325_v36 }
 0x2fd   :  { %3700 = vmatmul.mubr.msk.f32.gmra.mrb[36].mxu1 %vm36_vm0, %v6193_v49  ;;  %v5040_v49 = vld [vmem:[%s6127_s0 + $0x158] sm:$0xff] }
 0x2fe   :  { %4091 = vmatpush3.bf16.msra.mxu1 %v4088_v6  ;;  %3702 = vmatprep.mubr.msk.f32.mxu1 %vm36_vm0, %v6194_v47  ;;  %v4330_v6 = vunpack.i.l.bf16 %v4329_v52  ;;  %v5057_v47 = vld [vmem:[%s6127_s0 + $0x170] sm:$0xff] }
 0x2ff   :  { %4093 = vmatprep.subr.bf16.mxu1 %v4092_v26 }
 0x300   :  { %v4108_v55 = vpack.c.bf16 %v4331_v35, %v4330_v6 }
 0x301   :  { %3703 = vmatmul.mubr.msk.f32.gmra.mrb[38].mxu1 %vm36_vm0, %v6195_v63 }
 0x302   :  { %4095 = vmatpush3.bf16.msra.mxu1 %v4092_v26  ;;  %3705 = vmatprep.mubr.msk.f32.mxu1 %vm36_vm0, %v6196_v13  ;;  %v5045_v26 = vld [vmem:[%s6127_s0 + $0x160] sm:$0xff] }
 0x303   :  { %4097 = vmatprep.subr.bf16.mxu1 %v4096_v11 }
 0x305   :  { %3706 = vmatmul.mubr.msk.f32.gmra.mrb[40].mxu1 %vm36_vm0, %v6197_v57 }
 0x306   :  { %4099 = vmatpush3.bf16.msra.mxu1 %v4096_v11  ;;  %3708 = vmatprep.mubr.msk.f32.mxu1 %vm36_vm0, %v6198_v45 }
 0x307   :  { %4101 = vmatprep.subr.bf16.mxu1 %v4100_v12 }
 0x309   :  { %3709 = vmatmul.mubr.msk.f32.gmra.mrb[42].mxu1 %vm36_vm0, %v6199_v3 }
 0x30a   :  { %4103 = vmatpush3.bf16.msra.mxu1 %v4100_v12  ;;  %3711 = vmatprep.mubr.msk.f32.mxu1 %vm36_vm0, %v1015_v1  ;;  %v5009_v1 = vld [vmem:[%s6127_s0 + $0x130] sm:$0xff] }
 0x30b   :  { %4105 = vmatprep.subr.bf16.mxu1 %v4104_v9 }
 0x30d   :  { %3712 = vmatmul.mubr.msk.f32.gmra.mrb[44].mxu1 %vm36_vm0, %v1016_v8  ;;  %v5004_v8 = vld [vmem:[%s6127_s0 + $0x128] sm:$0xff] }
 0x30e   :  { %4107 = vmatpush3.bf16.msra.mxu1 %v4104_v9  ;;  %3714 = vmatprep.mubr.msk.f32.mxu1 %vm36_vm0, %v1017_v62  ;;  %v4992_v62 = vld [vmem:[%s6127_s0 + $0x118] sm:$0xff] }
 0x30f   :  { %4109 = vmatprep.subr.bf16.mxu1 %v4108_v55 }
 0x311   :  { %3715 = vmatmul.mubr.msk.f32.gmra.mrb[46].mxu1 %vm36_vm0, %v1018_v10  ;;  %v5016_v10 = vld [vmem:[%s6127_s0 + $0x138] sm:$0xff] }
 0x312   :  { %4111 = vmatpush3.bf16.msra.mxu1 %v4108_v55  ;;  %3805 = vmatprep.mubr.f32.mxu1 %v3137_v0 }
 0x315   :  { %3806 = vmatmul.mubr.f32.vlgmr.msra.gmra.mrb[48].mxu1 %v4980_v5 }
 0x316   :  { %3808 = vmatprep.mubr.f32.mxu1 %v4985_v2 }
 0x319   :  { %3809 = vmatmul.mubr.f32.gmra.mrb[50].mxu1 %v4992_v62 }
 0x31a   :  { %3811 = vmatprep.mubr.f32.mxu1 %v4997_v7 }
 0x31d   :  { %3812 = vmatmul.mubr.f32.gmra.mrb[52].mxu1 %v5004_v8 }
 0x31e   :  { %3814 = vmatprep.mubr.f32.mxu1 %v5009_v1 }
 0x321   :  { %3815 = vmatmul.mubr.f32.gmra.mrb[54].mxu1 %v5016_v10 }
 0x322   :  { %3817 = vmatprep.mubr.f32.mxu1 %v5021_v33 }
 0x325   :  { %3818 = vmatmul.mubr.f32.gmra.mrb[56].mxu1 %v5028_v17 }
 0x326   :  { %3820 = vmatprep.mubr.f32.mxu1 %v5033_v59 }
 0x329   :  { %3821 = vmatmul.mubr.f32.gmra.mrb[58].mxu1 %v5040_v49 }
 0x32a   :  { %3823 = vmatprep.mubr.f32.mxu1 %v5045_v26 }
 0x32d   :  { %3824 = vmatmul.mubr.f32.gmra.mrb[60].mxu1 %v5052_v27 }
 0x32e   :  { %3826 = vmatprep.mubr.f32.mxu1 %v5057_v47 }
 0x331   :  { %3827 = vmatmul.mubr.f32.gmra.mrb[62].mxu1 %v5064_v4 }
 0x332   :  { %3893 = vmatprep.mubr.f32.mxu1 %v3137_v0 }
 0x3a8   :  { %v3607_v14 = vpop.f32.mrb[16].mxu1 }
 0x3a9   :  { %v684_v63 = vadd.f32 %v3607_v14, %v4786_v60  ;;  %v678_v11 = vpop.f32.mrb[17].mxu1 }
 0x3aa   :  { %v679_v37 = vadd.f32 %v4786_v60, %v678_v11 }
 0x3ab   :  { %v758_v13 = vmax.f32 %v684_v63, 0.0 }
 0x3ac   :  { %v757_v20 = vmax.f32 %v679_v37, 0.0  ;;  %v3610_v36 = vpop.f32.mrb[18].mxu1 }
 0x3ad   :  { %v694_v57 = vadd.f32 %v3610_v36, %v4786_v60  ;;  %1989 = vrot.lane.b32.xlu1 %v758_v13, %s4338_s10  ;;  %v688_v12 = vpop.f32.mrb[19].mxu1 }
 0x3ae   :  { %v689_v52 = vadd.f32 %v4786_v60, %v688_v12  ;;  %1987 = vrot.lane.b32.xlu0 %v757_v20, %s4338_s10 }
 0x3af   :  { %v760_v45 = vmax.f32 %v694_v57, 0.0 }
 0x3b0   :  { %v759_v35 = vmax.f32 %v689_v52, 0.0  ;;  %v3613_v6 = vpop.f32.mrb[20].mxu1 }
 0x3b1   :  { %v704_v3 = vadd.f32 %v3613_v6, %v4786_v60  ;;  %1993 = vrot.lane.b32.xlu1 %v760_v45, %s4338_s10  ;;  %v698_v9 = vpop.f32.mrb[21].mxu1 }
 0x3b2   :  { %v699_v55 = vadd.f32 %v4786_v60, %v698_v9  ;;  %1991 = vrot.lane.b32.xlu0 %v759_v35, %s4338_s10 }
 0x3b3   :  { %v762_v0 = vmax.f32 %v704_v3, 0.0 }
 0x3b4   :  { %v761_v14 = vmax.f32 %v699_v55, 0.0  ;;  %v3616_v63 = vpop.f32.mrb[22].mxu1 }
 0x3b5   :  { %v714_v11 = vadd.f32 %v3616_v63, %v4786_v60  ;;  %1997 = vrot.lane.b32.xlu1 %v762_v0, %s4338_s10  ;;  %v708_v37 = vpop.f32.mrb[23].mxu1 }
 0x3b6   :  { %v709_v13 = vadd.f32 %v4786_v60, %v708_v37  ;;  %1995 = vrot.lane.b32.xlu0 %v761_v14, %s4338_s10 }
 0x3b7   :  { %v764_v20 = vmax.f32 %v714_v11, 0.0 }
 0x3b8   :  { %v763_v36 = vmax.f32 %v709_v13, 0.0  ;;  %v3619_v57 = vpop.f32.mrb[24].mxu1 }
 0x3b9   :  { %v724_v12 = vadd.f32 %v3619_v57, %v4786_v60  ;;  %2001 = vrot.lane.b32.xlu1 %v764_v20, %s4338_s10  ;;  %v718_v52 = vpop.f32.mrb[25].mxu1 }
 0x3ba   :  { %v719_v45 = vadd.f32 %v4786_v60, %v718_v52  ;;  %1999 = vrot.lane.b32.xlu0 %v763_v36, %s4338_s10 }
 0x3bb   :  { %v766_v35 = vmax.f32 %v724_v12, 0.0 }
 0x3bc   :  { %v765_v6 = vmax.f32 %v719_v45, 0.0  ;;  %v3622_v3 = vpop.f32.mrb[26].mxu1 }
 0x3bd   :  { %v734_v9 = vadd.f32 %v3622_v3, %v4786_v60  ;;  %2005 = vrot.lane.b32.xlu1 %v766_v35, %s4338_s10  ;;  %v728_v55 = vpop.f32.mrb[27].mxu1 }
 0x3be   :  { %v729_v0 = vadd.f32 %v4786_v60, %v728_v55  ;;  %2003 = vrot.lane.b32.xlu0 %v765_v6, %s4338_s10 }
 0x3bf   :  { %v768_v14 = vmax.f32 %v734_v9, 0.0 }
 0x3c0   :  { %v767_v63 = vmax.f32 %v729_v0, 0.0  ;;  %v3625_v11 = vpop.f32.mrb[28].mxu1 }
 0x3c1   :  { %v744_v37 = vadd.f32 %v3625_v11, %v4786_v60  ;;  %2009 = vrot.lane.b32.xlu1 %v768_v14, %s4338_s10  ;;  %v738_v13 = vpop.f32.mrb[29].mxu1 }
 0x3c2   :  { %v739_v20 = vadd.f32 %v4786_v60, %v738_v13  ;;  %2007 = vrot.lane.b32.xlu0 %v767_v63, %s4338_s10 }
 0x3c3   :  { %v770_v36 = vmax.f32 %v744_v37, 0.0 }
 0x3c4   :  { %v769_v57 = vmax.f32 %v739_v20, 0.0  ;;  %v3628_v12 = vpop.f32.mrb[30].mxu1 }
 0x3c5   :  { %v754_v52 = vadd.f32 %v3628_v12, %v4786_v60  ;;  %2013 = vrot.lane.b32.xlu1 %v770_v36, %s4338_s10  ;;  %v748_v45 = vpop.f32.mrb[31].mxu1 }
 0x3c6   :  { %v749_v35 = vadd.f32 %v4786_v60, %v748_v45  ;;  %2011 = vrot.lane.b32.xlu0 %v769_v57, %s4338_s10 }
 0x3c7   :  { %v772_v6 = vmax.f32 %v754_v52, 0.0 }
 0x3c8   :  { %v771_v3 = vmax.f32 %v749_v35, 0.0  ;;  %v3695_v9 = vpop.f32.mrb[32].mxu1 }
 0x3c9   :  { %2017 = vrot.lane.b32.xlu1 %v772_v6, %s4338_s10  ;;  %v1137_v55 = vpop.f32.mrb[33].mxu1 }
 0x3ca   :  { %v4048_v0 = vpack.c.bf16 %v3695_v9, %v1137_v55  ;;  %2015 = vrot.lane.b32.xlu0 %v771_v3, %s4338_s10 }
 0x3cc   :  { %v3698_v14 = vpop.f32.mrb[34].mxu1  ;;  %4049 = vmatprep.subr.bf16.mxu0 %v4048_v0 }
 0x3cd   :  { %v1147_v63 = vpop.f32.mrb[35].mxu1  ;;  %4051 = vmatpush3.bf16.msra.mxu0 %v4048_v0 }
 0x3ce   :  { %v4052_v11 = vpack.c.bf16 %v3698_v14, %v1147_v63  ;;  %v1610_v14 = vld [vmem:[%s6125_s2 + $0x60] sm:$0xff]  ;;  %v1611_v63 = vld [vmem:[%s6125_s2 + $0x68] sm:$0xff] }
 0x3d0   :  { %v3701_v37 = vpop.f32.mrb[36].mxu1  ;;  %4053 = vmatprep.subr.bf16.mxu0 %v4052_v11 }
 0x3d1   :  { %v1157_v13 = vpop.f32.mrb[37].mxu1  ;;  %4055 = vmatpush3.bf16.msra.mxu0 %v4052_v11 }
 0x3d2   :  { %v4056_v60 = vpack.c.bf16 %v3701_v37, %v1157_v13 }
 0x3d4   :  { %v3704_v20 = vpop.f32.mrb[38].mxu1  ;;  %4057 = vmatprep.subr.bf16.mxu0 %v4056_v60 }
 0x3d5   :  { %v1167_v36 = vpop.f32.mrb[39].mxu1  ;;  %4059 = vmatpush3.bf16.msra.mxu0 %v4056_v60  ;;  %v4112_v60 = vpack.c.bf16 %v1611_v63, %v1610_v14 }
 0x3d6   :  { %v4060_v57 = vpack.c.bf16 %v3704_v20, %v1167_v36  ;;  %v1612_v20 = vld [vmem:[%s6125_s2 + $0x70] sm:$0xff]  ;;  %v1613_v36 = vld [vmem:[%s6125_s2 + $0x78] sm:$0xff] }
 0x3d8   :  { %v3707_v12 = vpop.f32.mrb[40].mxu1  ;;  %4061 = vmatprep.subr.bf16.mxu0 %v4060_v57 }
 0x3d9   :  { %v1177_v52 = vpop.f32.mrb[41].mxu1  ;;  %4063 = vmatpush3.bf16.msra.mxu0 %v4060_v57 }
 0x3da   :  { %v4064_v45 = vpack.c.bf16 %v3707_v12, %v1177_v52  ;;  %v4116_v52 = vpack.c.bf16 %v1613_v36, %v1612_v20 }
 0x3dc   :  { %v3710_v35 = vpop.f32.mrb[42].mxu1  ;;  %4065 = vmatprep.subr.bf16.mxu0 %v4064_v45 }
 0x3dd   :  { %v1187_v6 = vpop.f32.mrb[43].mxu1  ;;  %4067 = vmatpush3.bf16.msra.mxu0 %v4064_v45 }
 0x3de   :  { %v4068_v3 = vpack.c.bf16 %v3710_v35, %v1187_v6 }
 0x3e0   :  { %v3713_v9 = vpop.f32.mrb[44].mxu1  ;;  %4069 = vmatprep.subr.bf16.mxu0 %v4068_v3 }
 0x3e1   :  { %v1197_v55 = vpop.f32.mrb[45].mxu1  ;;  %4071 = vmatpush3.bf16.msra.mxu0 %v4068_v3 }
 0x3e2   :  { %v4072_v0 = vpack.c.bf16 %v3713_v9, %v1197_v55 }
 0x3e4   :  { %v3716_v11 = vpop.f32.mrb[46].mxu1  ;;  %4073 = vmatprep.subr.bf16.mxu0 %v4072_v0 }
 0x3e5   :  { %v1207_v37 = vpop.f32.mrb[47].mxu1  ;;  %4075 = vmatpush3.bf16.msra.mxu0 %v4072_v0  ;;  %v1447_v0 = vpop.permute.xlu1 %1446 }
 0x3e6   :  { %v4076_v13 = vpack.c.bf16 %v3716_v11, %v1207_v37 }
 0x3e8   :  { %4077 = vmatprep.subr.bf16.mxu0 %v4076_v13  ;;  %v3807_v57 = vpop.f32.mrb[48].mxu1 }
 0x3e9   :  { %4079 = vmatpush3.bf16.msra.mxu0 %v4076_v13  ;;  %v1515_v12 = vpop.f32.mrb[49].mxu1 }
 0x3ea   :  { %4113 = vmatprep.subr.bf16.mxu0 %v4112_v60  ;;  %v5122_v14 = vadd.f32 %v1515_v12, %v1447_v0 }
 0x3ec   :  { %3750 = vmatmul.mubr.f32.vlgmr.msra.gmra.mrb[48].mxu0 %v4696_v15  ;;  %v3810_v45 = vpop.f32.mrb[50].mxu1 }
 0x3ed   :  { %4115 = vmatpush3.bf16.msra.mxu0 %v4112_v60  ;;  %3752 = vmatprep.mubr.f32.mxu0 %v4701_v16  ;;  %v1525_v35 = vpop.f32.mrb[51].mxu1 }
 0x3ee   :  { %4117 = vmatprep.subr.bf16.mxu0 %v4116_v52 }
 0x3f0   :  { %3753 = vmatmul.mubr.f32.gmra.mrb[50].mxu0 %v4708_v18  ;;  %v3813_v6 = vpop.f32.mrb[52].mxu1 }
 0x3f1   :  { %3755 = vmatprep.mubr.f32.mxu0 %v4713_v24  ;;  %v1535_v3 = vpop.f32.mrb[53].mxu1  ;;  %4119 = vmatpush3.bf16.msra.mxu0 %v4116_v52 }
 0x3f2   :  { %v5140_v11 = vadd.f32 %v1535_v3, %v1447_v0 }
 0x3f4   :  { %3756 = vmatmul.mubr.f32.gmra.mrb[52].mxu0 %v4720_v22  ;;  %v3816_v9 = vpop.f32.mrb[54].mxu1  ;;  %v6163_v37 = vmax.f32 %v5140_v11, 0.0 }
 0x3f5   :  { %3758 = vmatprep.mubr.f32.mxu0 %v4725_v29  ;;  %v1545_v55 = vpop.f32.mrb[55].mxu1  ;;  %v5161_v20 = vadd.f32 %v3816_v9, %v1447_v0 }
 0x3f6   :  { %v5152_v13 = vadd.f32 %v1545_v55, %v1447_v0 }
 0x3f7   :  { %v6161_v12 = vmax.f32 %v5161_v20, 0.0 }
 0x3f8   :  { %3759 = vmatmul.mubr.f32.gmra.mrb[54].mxu0 %v4732_v31  ;;  %v3819_v15 = vpop.f32.mrb[56].mxu1  ;;  %v6160_v36 = vmax.f32 %v5152_v13, 0.0 }
 0x3f9   :  { %3761 = vmatprep.mubr.f32.mxu0 %v4737_v32  ;;  %v1555_v16 = vpop.f32.mrb[57].mxu1  ;;  %v6168_v32 = vmax.f32 %v5122_v14, 0.0  ;;  %v5173_v52 = vadd.f32 %v3819_v15, %v1447_v0 }
 0x3fc   :  { %3762 = vmatmul.mubr.f32.gmra.mrb[56].mxu0 %v4744_v34  ;;  %v3822_v18 = vpop.f32.mrb[58].mxu1  ;;  %v5128_v34 = vadd.f32 %v3807_v57, %v1447_v0  ;;  %v5164_v57 = vadd.f32 %v1555_v16, %v1447_v0 }
 0x3fd   :  { %3764 = vmatprep.mubr.f32.mxu0 %v4749_v41  ;;  %v1565_v24 = vpop.f32.mrb[59].mxu1  ;;  %v5130_v41 = vadd.f32 %v1525_v35, %v1447_v0  ;;  %v5185_v3 = vadd.f32 %v3822_v18, %v1447_v0 }
 0x3fe   :  { %v5176_v35 = vadd.f32 %v1565_v24, %v1447_v0 }
 0x3ff   :  { %6201 = vst [vmem:[#allocation6_spill] sm:$0xff] %v5185_v3  ;;  %v6157_v15 = vmax.f32 %v5185_v3, 0.0 }
 0x400   :  { %3765 = vmatmul.mubr.f32.gmra.mrb[58].mxu0 %v4756_v43  ;;  %v3825_v22 = vpop.f32.mrb[60].mxu1  ;;  %v6169_v43 = vmax.f32 %v5128_v34, 0.0  ;;  %6200 = vst [vmem:[#allocation5_spill] sm:$0xff] %v5176_v35  ;;  %v6155_v9 = vmax.f32 %v5176_v35, 0.0 }
 0x401   :  { %3767 = vmatprep.mubr.f32.mxu0 %v4761_v44  ;;  %v1575_v29 = vpop.f32.mrb[61].mxu1  ;;  %v5137_v44 = vadd.f32 %v3810_v45, %v1447_v0  ;;  %v6154_v45 = vmax.f32 %v5164_v57, 0.0  ;;  %v5197_v16 = vadd.f32 %v3825_v22, %v1447_v0 }
 0x402   :  { %v5188_v55 = vadd.f32 %v1575_v29, %v1447_v0 }
 0x403   :  { %6203 = vst [vmem:[#allocation8_spill] sm:$0xff] %v5197_v16  ;;  %v6159_v29 = vmax.f32 %v5197_v16, 0.0 }
 0x404   :  { %3768 = vmatmul.mubr.f32.gmra.mrb[60].mxu0 %v4768_v46  ;;  %v3828_v31 = vpop.f32.mrb[62].mxu1  ;;  %v6166_v46 = vmax.f32 %v5130_v41, 0.0  ;;  %6202 = vst [vmem:[#allocation7_spill] sm:$0xff] %v5188_v55  ;;  %v6156_v24 = vmax.f32 %v5188_v55, 0.0 }
 0x405   :  { %v1585_v63 = vpop.f32.mrb[63].mxu1  ;;  %3770 = vmatprep.mubr.f32.mxu0 %v4773_v51  ;;  %v6167_v51 = vmax.f32 %v5137_v44, 0.0 }
 0x406   :  { %v5200_v18 = vadd.f32 %v1585_v63, %v1447_v0  ;;  %v5222_v63 = vpop.permute.xlu1 %1217 }
 0x408   :  { %3771 = vmatmul.mubr.f32.gmra.mrb[62].mxu0 %v4780_v54  ;;  %v5149_v54 = vadd.f32 %v3813_v6, %v1447_v0  ;;  %v6158_v6 = vmax.f32 %v5173_v52, 0.0  ;;  %6204 = vst [vmem:[#allocation9_spill] sm:$0xff] %v5200_v18 }
 0x409   :  { %3837 = vmatprep.mubr.msk.f32.mxu0 %vm36_vm0, %v6168_v32 }
 0x40a   :  { %v6165_v60 = vmax.f32 %v5149_v54, 0.0 }
 0x40c   :  { %3838 = vmatmul.mubr.msk.f32.vlgmr.msra.gmra.mrb[64].mxu0 %vm36_vm0, %v6169_v43 }
 0x40d   :  { %3840 = vmatprep.mubr.msk.f32.mxu0 %vm36_vm0, %v6166_v46 }
 0x410   :  { %3841 = vmatmul.mubr.msk.f32.gmra.mrb[66].mxu0 %vm36_vm0, %v6167_v51 }
 0x411   :  { %3843 = vmatprep.mubr.msk.f32.mxu0 %vm36_vm0, %v6163_v37 }
 0x414   :  { %3844 = vmatmul.mubr.msk.f32.gmra.mrb[68].mxu0 %vm36_vm0, %v6165_v60 }
 0x415   :  { %3846 = vmatprep.mubr.msk.f32.mxu0 %vm36_vm0, %v6160_v36 }
 0x418   :  { %3847 = vmatmul.mubr.msk.f32.gmra.mrb[70].mxu0 %vm36_vm0, %v6161_v12 }
 0x419   :  { %3849 = vmatprep.mubr.msk.f32.mxu0 %vm36_vm0, %v6154_v45  ;;  %v5209_v45 = vadd.f32 %v3828_v31, %v1447_v0 }
 0x41b   :  { %6205 = vst [vmem:[#allocation10_spill] sm:$0xff] %v5209_v45  ;;  %v6164_v22 = vmax.f32 %v5209_v45, 0.0 }
 0x41c   :  { %3850 = vmatmul.mubr.msk.f32.gmra.mrb[72].mxu0 %vm36_vm0, %v6158_v6 }
 0x41d   :  { %3852 = vmatprep.mubr.msk.f32.mxu0 %vm36_vm0, %v6155_v9  ;;  %v6162_v9 = vmax.f32 %v5200_v18, 0.0 }
 0x420   :  { %3853 = vmatmul.mubr.msk.f32.gmra.mrb[74].mxu0 %vm36_vm0, %v6157_v15 }
 0x421   :  { %3855 = vmatprep.mubr.msk.f32.mxu0 %vm36_vm0, %v6156_v24 }
 0x424   :  { %3856 = vmatmul.mubr.msk.f32.gmra.mrb[76].mxu0 %vm36_vm0, %v6159_v29 }
 0x425   :  { %3858 = vmatprep.mubr.msk.f32.mxu0 %vm36_vm0, %v6162_v9 }
 0x428   :  { %3859 = vmatmul.mubr.msk.f32.gmra.mrb[78].mxu0 %vm36_vm0, %v6164_v22 }
 0x4bf   :  { %v3751_v0 = vpop.f32.mrb[48].mxu0 }
 0x4c0   :  { %v1292_v31 = vadd.f32 %v3751_v0, %v5222_v63  ;;  %v1286_v24 = vpop.f32.mrb[49].mxu0 }
 0x4c1   :  { %v1287_v15 = vadd.f32 %v1286_v24, %v5222_v63 }
 0x4c2   :  { %v1366_v6 = vmax.f32 %v1292_v31, 0.0 }
 0x4c3   :  { %v1365_v29 = vmax.f32 %v1287_v15, 0.0  ;;  %v3754_v36 = vpop.f32.mrb[50].mxu0 }
 0x4c4   :  { %v1302_v12 = vadd.f32 %v3754_v36, %v5222_v63  ;;  %2101 = vrot.lane.b32.xlu1 %v1366_v6, %s4336_s7  ;;  %v1296_v9 = vpop.f32.mrb[51].mxu0 }
 0x4c5   :  { %v1297_v37 = vadd.f32 %v1296_v9, %v5222_v63  ;;  %2099 = vrot.lane.b32.xlu0 %v1365_v29, %s4336_s7 }
 0x4c6   :  { %v1368_v22 = vmax.f32 %v1302_v12, 0.0 }
 0x4c7   :  { %v1367_v60 = vmax.f32 %v1297_v37, 0.0  ;;  %v3757_v46 = vpop.f32.mrb[52].mxu0 }
 0x4c8   :  { %v1312_v0 = vadd.f32 %v3757_v46, %v5222_v63  ;;  %2105 = vrot.lane.b32.xlu1 %v1368_v22, %s4336_s7  ;;  %v1306_v24 = vpop.f32.mrb[53].mxu0 }
 0x4c9   :  { %v1307_v15 = vadd.f32 %v1306_v24, %v5222_v63  ;;  %2103 = vrot.lane.b32.xlu0 %v1367_v60, %s4336_s7 }
 0x4ca   :  { %v1370_v36 = vmax.f32 %v1312_v0, 0.0 }
 0x4cb   :  { %v1369_v31 = vmax.f32 %v1307_v15, 0.0  ;;  %v3760_v6 = vpop.f32.mrb[54].mxu0 }
 0x4cc   :  { %v1322_v51 = vadd.f32 %v3760_v6, %v5222_v63  ;;  %2109 = vrot.lane.b32.xlu1 %v1370_v36, %s4336_s7  ;;  %v1316_v9 = vpop.f32.mrb[55].mxu0 }
 0x4cd   :  { %v1317_v37 = vadd.f32 %v1316_v9, %v5222_v63  ;;  %2107 = vrot.lane.b32.xlu0 %v1369_v31, %s4336_s7 }
 0x4ce   :  { %v1372_v46 = vmax.f32 %v1322_v51, 0.0 }
 0x4cf   :  { %v1371_v12 = vmax.f32 %v1317_v37, 0.0  ;;  %v3763_v29 = vpop.f32.mrb[56].mxu0 }
 0x4d0   :  { %v1332_v22 = vadd.f32 %v3763_v29, %v5222_v63  ;;  %2113 = vrot.lane.b32.xlu1 %v1372_v46, %s4336_s7  ;;  %v1326_v60 = vpop.f32.mrb[57].mxu0 }
 0x4d1   :  { %v1327_v0 = vadd.f32 %v1326_v60, %v5222_v63  ;;  %2111 = vrot.lane.b32.xlu0 %v1371_v12, %s4336_s7 }
 0x4d2   :  { %v1374_v24 = vmax.f32 %v1332_v22, 0.0 }
 0x4d3   :  { %v1373_v15 = vmax.f32 %v1327_v0, 0.0  ;;  %v3766_v36 = vpop.f32.mrb[58].mxu0 }
 0x4d4   :  { %v1342_v6 = vadd.f32 %v3766_v36, %v5222_v63  ;;  %2117 = vrot.lane.b32.xlu1 %v1374_v24, %s4336_s7  ;;  %v1336_v31 = vpop.f32.mrb[59].mxu0 }
 0x4d5   :  { %v1337_v51 = vadd.f32 %v1336_v31, %v5222_v63  ;;  %2115 = vrot.lane.b32.xlu0 %v1373_v15, %s4336_s7 }
 0x4d6   :  { %v1376_v9 = vmax.f32 %v1342_v6, 0.0 }
 0x4d7   :  { %v1375_v37 = vmax.f32 %v1337_v51, 0.0  ;;  %v3769_v46 = vpop.f32.mrb[60].mxu0 }
 0x4d8   :  { %v1352_v29 = vadd.f32 %v3769_v46, %v5222_v63  ;;  %2121 = vrot.lane.b32.xlu1 %v1376_v9, %s4336_s7  ;;  %v1346_v12 = vpop.f32.mrb[61].mxu0 }
 0x4d9   :  { %v1347_v22 = vadd.f32 %v1346_v12, %v5222_v63  ;;  %2119 = vrot.lane.b32.xlu0 %v1375_v37, %s4336_s7 }
 0x4da   :  { %v1378_v60 = vmax.f32 %v1352_v29, 0.0 }
 0x4db   :  { %v1377_v0 = vmax.f32 %v1347_v22, 0.0  ;;  %v5250_v24 = vpop.f32.mrb[62].mxu0 }
 0x4dc   :  { %2125 = vrot.lane.b32.xlu1 %v1378_v60, %s4336_s7  ;;  %v5253_v36 = vpop.f32.mrb[63].mxu0 }
 0x4dd   :  { %2123 = vrot.lane.b32.xlu0 %v1377_v0, %s4336_s7 }
 0x4df   :  { %v3839_v15 = vpop.f32.mrb[64].mxu0 }
 0x4e0   :  { %v1728_v6 = vpop.f32.mrb[65].mxu0 }
 0x4e1   :  { %v4120_v31 = vpack.c.bf16 %v3839_v15, %v1728_v6 }
 0x4e3   :  { %v3842_v51 = vpop.f32.mrb[66].mxu0  ;;  %4121 = vmatprep.subr.bf16.mxu1 %v4120_v31 }
 0x4e4   :  { %v1738_v9 = vpop.f32.mrb[67].mxu0  ;;  %4123 = vmatpush3.bf16.msra.mxu1 %v4120_v31 }
 0x4e5   :  { %v4124_v46 = vpack.c.bf16 %v3842_v51, %v1738_v9 }
 0x4e7   :  { %v3845_v12 = vpop.f32.mrb[68].mxu0  ;;  %4125 = vmatprep.subr.bf16.mxu1 %v4124_v46 }
 0x4e8   :  { %v1748_v37 = vpop.f32.mrb[69].mxu0  ;;  %4127 = vmatpush3.bf16.msra.mxu1 %v4124_v46 }
 0x4e9   :  { %v4128_v29 = vpack.c.bf16 %v3845_v12, %v1748_v37 }
 0x4eb   :  { %v3848_v22 = vpop.f32.mrb[70].mxu0  ;;  %4129 = vmatprep.subr.bf16.mxu1 %v4128_v29 }
 0x4ec   :  { %v1758_v60 = vpop.f32.mrb[71].mxu0  ;;  %4131 = vmatpush3.bf16.msra.mxu1 %v4128_v29 }
 0x4ed   :  { %v4132_v32 = vpack.c.bf16 %v3848_v22, %v1758_v60 }
 0x4ef   :  { %v3851_v43 = vpop.f32.mrb[72].mxu0  ;;  %4133 = vmatprep.subr.bf16.mxu1 %v4132_v32 }
 0x4f0   :  { %v1768_v0 = vpop.f32.mrb[73].mxu0  ;;  %4135 = vmatpush3.bf16.msra.mxu1 %v4132_v32 }
 0x4f1   :  { %v4136_v15 = vpack.c.bf16 %v3851_v43, %v1768_v0 }
 0x4f3   :  { %v3854_v6 = vpop.f32.mrb[74].mxu0  ;;  %4137 = vmatprep.subr.bf16.mxu1 %v4136_v15 }
 0x4f4   :  { %v1778_v18 = vpop.f32.mrb[75].mxu0  ;;  %4139 = vmatpush3.bf16.msra.mxu1 %v4136_v15 }
 0x4f5   :  { %v4140_v31 = vpack.c.bf16 %v3854_v6, %v1778_v18 }
 0x4f7   :  { %v3857_v51 = vpop.f32.mrb[76].mxu0  ;;  %4141 = vmatprep.subr.bf16.mxu1 %v4140_v31 }
 0x4f8   :  { %v1788_v9 = vpop.f32.mrb[77].mxu0  ;;  %4143 = vmatpush3.bf16.msra.mxu1 %v4140_v31 }
 0x4f9   :  { %v4144_v46 = vpack.c.bf16 %v3857_v51, %v1788_v9 }
 0x4fb   :  { %v3860_v12 = vpop.f32.mrb[78].mxu0  ;;  %4145 = vmatprep.subr.bf16.mxu1 %v4144_v46 }
 0x4fc   :  { %v1798_v37 = vpop.f32.mrb[79].mxu0  ;;  %4147 = vmatpush3.bf16.msra.mxu1 %v4144_v46 }
 0x4fd   :  { %v4148_v29 = vpack.c.bf16 %v3860_v12, %v1798_v37 }
 0x4ff   :  { %4149 = vmatprep.subr.bf16.mxu1 %v4148_v29 }
 0x500   :  { %4151 = vmatpush3.bf16.msra.mxu1 %v4148_v29 }
 0x503   :  { %3894 = vmatmul.mubr.f32.vlgmr.msra.gmra.mrb[64].mxu1 %v4980_v5  ;;  %v5271_v5 = vpop.permute.xlu0 %1807 }
 0x504   :  { %3896 = vmatprep.mubr.f32.mxu1 %v4985_v2  ;;  %v5273_v2 = vpop.permute.xlu1 %2037 }
 0x507   :  { %3897 = vmatmul.mubr.f32.gmra.mrb[66].mxu1 %v4992_v62  ;;  %v5275_v62 = vpop.permute.xlu0 %2035 }
 0x508   :  { %3899 = vmatprep.mubr.f32.mxu1 %v4997_v7  ;;  %v5277_v7 = vpop.permute.xlu1 %2041 }
 0x50b   :  { %3900 = vmatmul.mubr.f32.gmra.mrb[68].mxu1 %v5004_v8  ;;  %v5279_v8 = vpop.permute.xlu0 %2039 }
 0x50c   :  { %3902 = vmatprep.mubr.f32.mxu1 %v5009_v1  ;;  %v5281_v1 = vpop.permute.xlu1 %2045 }
 0x50f   :  { %3903 = vmatmul.mubr.f32.gmra.mrb[70].mxu1 %v5016_v10  ;;  %v5283_v10 = vpop.permute.xlu0 %2043 }
 0x510   :  { %3905 = vmatprep.mubr.f32.mxu1 %v5021_v33 }
 0x513   :  { %3906 = vmatmul.mubr.f32.gmra.mrb[72].mxu1 %v5028_v17  ;;  %v5291_v18 = vpop.permute.xlu0 %2047 }
 0x514   :  { %3908 = vmatprep.mubr.f32.mxu1 %v5033_v59 }
 0x517   :  { %3909 = vmatmul.mubr.f32.gmra.mrb[74].mxu1 %v5040_v49  ;;  %v5301_v12 = vpop.permute.xlu0 %2051 }
 0x518   :  { %3911 = vmatprep.mubr.f32.mxu1 %v5045_v26 }
 0x51b   :  { %3912 = vmatmul.mubr.f32.gmra.mrb[76].mxu1 %v5052_v27 }
 0x51c   :  { %3914 = vmatprep.mubr.f32.mxu1 %v5057_v47 }
 0x51f   :  { %3915 = vmatmul.mubr.f32.gmra.mrb[78].mxu1 %v5064_v4  ;;  %v5287_v4 = vpop.permute.xlu1 %2049 }
 0x523   :  { %v5299_v9 = vpop.permute.xlu1 %2053 }
 0x5d6   :  { %v3895_v33 = vpop.f32.mrb[64].mxu1 }
 0x5d7   :  { %v1882_v17 = vadd.f32 %v3895_v33, %v5271_v5  ;;  %v1876_v59 = vpop.f32.mrb[65].mxu1 }
 0x5d8   :  { %v1877_v49 = vadd.f32 %v1876_v59, %v5271_v5 }
 0x5d9   :  { %v1956_v26 = vmax.f32 %v1882_v17, 0.0 }
 0x5da   :  { %v1955_v27 = vmax.f32 %v1877_v49, 0.0  ;;  %v3898_v47 = vpop.f32.mrb[66].mxu1 }
 0x5db   :  { %v1892_v32 = vadd.f32 %v3898_v47, %v5271_v5  ;;  %2165 = vrot.lane.b32.xlu1 %v1956_v26, %s4338_s10  ;;  %v1886_v43 = vpop.f32.mrb[67].mxu1  ;;  %v5307_v47 = vpop.permute.xlu1 %2057 }
 0x5dc   :  { %v1887_v22 = vadd.f32 %v1886_v43, %v5271_v5  ;;  %2163 = vrot.lane.b32.xlu0 %v1955_v27, %s4338_s10  ;;  %6206 = vst [vmem:[#allocation11_spill] sm:$0xff] %v5307_v47 }
 0x5dd   :  { %v1958_v60 = vmax.f32 %v1892_v32, 0.0 }
 0x5de   :  { %v1957_v0 = vmax.f32 %v1887_v22, 0.0  ;;  %v3901_v15 = vpop.f32.mrb[68].mxu1  ;;  %v5311_v22 = vpop.permute.xlu0 %2055 }
 0x5df   :  { %v1902_v6 = vadd.f32 %v3901_v15, %v5271_v5  ;;  %2169 = vrot.lane.b32.xlu1 %v1958_v60, %s4338_s10  ;;  %v1896_v31 = vpop.f32.mrb[69].mxu1  ;;  %6207 = vst [vmem:[#allocation12_spill] sm:$0xff] %v5311_v22 }
 0x5e0   :  { %v1897_v51 = vadd.f32 %v1896_v31, %v5271_v5  ;;  %2167 = vrot.lane.b32.xlu0 %v1957_v0, %s4338_s10 }
 0x5e1   :  { %v1960_v46 = vmax.f32 %v1902_v6, 0.0 }
 0x5e2   :  { %v1959_v37 = vmax.f32 %v1897_v51, 0.0  ;;  %v3904_v29 = vpop.f32.mrb[70].mxu1 }
 0x5e3   :  { %v1912_v33 = vadd.f32 %v3904_v29, %v5271_v5  ;;  %2173 = vrot.lane.b32.xlu1 %v1960_v46, %s4338_s10  ;;  %v1906_v17 = vpop.f32.mrb[71].mxu1 }
 0x5e4   :  { %v1907_v59 = vadd.f32 %v1906_v17, %v5271_v5  ;;  %2171 = vrot.lane.b32.xlu0 %v1959_v37, %s4338_s10  ;;  %v5319_v37 = vpop.permute.xlu1 %2061 }
 0x5e5   :  { %v1962_v49 = vmax.f32 %v1912_v33, 0.0  ;;  %6208 = vst [vmem:[#allocation13_spill] sm:$0xff] %v5319_v37  ;;  %v5321_v33 = vpop.permute.xlu0 %2059 }
 0x5e6   :  { %v1961_v26 = vmax.f32 %v1907_v59, 0.0  ;;  %v3907_v27 = vpop.f32.mrb[72].mxu1  ;;  %6209 = vst [vmem:[#allocation14_spill] sm:$0xff] %v5321_v33 }
 0x5e7   :  { %v1922_v32 = vadd.f32 %v3907_v27, %v5271_v5  ;;  %2177 = vrot.lane.b32.xlu1 %v1962_v49, %s4338_s10  ;;  %v1916_v43 = vpop.f32.mrb[73].mxu1 }
 0x5e8   :  { %v1917_v60 = vadd.f32 %v1916_v43, %v5271_v5  ;;  %2175 = vrot.lane.b32.xlu0 %v1961_v26, %s4338_s10 }
 0x5e9   :  { %v1964_v0 = vmax.f32 %v1922_v32, 0.0 }
 0x5ea   :  { %v1963_v15 = vmax.f32 %v1917_v60, 0.0  ;;  %v3910_v6 = vpop.f32.mrb[74].mxu1 }
 0x5eb   :  { %v1932_v31 = vadd.f32 %v3910_v6, %v5271_v5  ;;  %2181 = vrot.lane.b32.xlu1 %v1964_v0, %s4338_s10  ;;  %v1926_v51 = vpop.f32.mrb[75].mxu1  ;;  %v5327_v0 = vpop.permute.xlu1 %2065 }
 0x5ec   :  { %v1927_v46 = vadd.f32 %v1926_v51, %v5271_v5  ;;  %2179 = vrot.lane.b32.xlu0 %v1963_v15, %s4338_s10  ;;  %6210 = vst [vmem:[#allocation15_spill] sm:$0xff] %v5327_v0  ;;  %v5332_v51 = vpop.permute.xlu0 %2063 }
 0x5ed   :  { %v1966_v29 = vmax.f32 %v1932_v31, 0.0  ;;  %v6171_v31 = vmov 0.0   ;;  %6211 = vst [vmem:[#allocation16_spill] sm:$0xff] %v5332_v51 }
 0x5ee   :  { %v1965_v17 = vmax.f32 %v1927_v46, 0.0  ;;  %v3913_v59 = vpop.f32.mrb[76].mxu1  ;;  %2349 = vmatprep.mubr.f32.mxu0 %v6171_v31 }
 0x5ef   :  { %v1942_v49 = vadd.f32 %v3913_v59, %v5271_v5  ;;  %2185 = vrot.lane.b32.xlu1 %v1966_v29, %s4338_s10  ;;  %v1936_v26 = vpop.f32.mrb[77].mxu1  ;;  %v1362_v29 = vadd.f32 %v5250_v24, %v5222_v63  ;;  %v2356_v59 = vld [vmem:[%s6125_s2 + $0xa0] sm:$0xff]  ;;  %v2358_v24 = vld [vmem:[%s6125_s2 + $0xb0] sm:$0xff] }
 0x5f0   :  { %v1937_v27 = vadd.f32 %v1936_v26, %v5271_v5  ;;  %2183 = vrot.lane.b32.xlu0 %v1965_v17, %s4338_s10  ;;  %v1357_v26 = vadd.f32 %v5253_v36, %v5222_v63 }
 0x5f1   :  { %v1968_v32 = vmax.f32 %v1942_v49, 0.0  ;;  %v2357_v49 = vld [vmem:[%s6125_s2 + $0xa8] sm:$0xff]  ;;  %v1380_v36 = vmax.f32 %v1362_v29, 0.0  ;;  %v2362_v29 = vld [vmem:[%s6125_s2 + $0xd0] sm:$0xff] }
 0x5f2   :  { %v1967_v43 = vmax.f32 %v1937_v27, 0.0  ;;  %v3916_v60 = vpop.f32.mrb[78].mxu1 }
 0x5f3   :  { %v1952_v15 = vadd.f32 %v3916_v60, %v5271_v5  ;;  %2189 = vrot.lane.b32.xlu1 %v1968_v32, %s4338_s10  ;;  %v1946_v6 = vpop.f32.mrb[79].mxu1  ;;  %v6180_v32 = vmov 0.0|0.0   ;;  %v5353_v60 = vpop.permute.xlu1 %1989 }
 0x5f4   :  { %v1947_v46 = vadd.f32 %v1946_v6, %v5271_v5  ;;  %2187 = vrot.lane.b32.xlu0 %v1967_v43, %s4338_s10  ;;  %4184 = vmatprep.subr.bf16.mxu1 %v6180_v32  ;;  %v4185_v5 = vpack.c.bf16 %v2357_v49, %v2356_v59  ;;  %v2359_v43 = vld [vmem:[%s6125_s2 + $0xb8] sm:$0xff]  ;;  %v2360_v6 = vld [vmem:[%s6125_s2 + $0xc0] sm:$0xff]  ;;  %v1379_v59 = vmax.f32 %v1357_v26, 0.0 }
 0x5f5   :  { %v1970_v17 = vmax.f32 %v1952_v15, 0.0  ;;  %v5356_v15 = vpop.permute.xlu0 %1987  ;;  %v4188_v63 = vpack.c.bf16 %v2359_v43, %v2358_v24  ;;  %v2364_v24 = vld [vmem:[%s6125_s2 + $0xe0] sm:$0xff]  ;;  %v2365_v43 = vld [vmem:[%s6125_s2 + $0xe8] sm:$0xff] }
 0x5f6   :  { %v1969_v27 = vmax.f32 %v1947_v46, 0.0  ;;  %4186 = vmatpush1.bf16.msra.mxu1 %v4185_v5  ;;  %v2361_v46 = vld [vmem:[%s6125_s2 + $0xc8] sm:$0xff] }
 0x5f7   :  { %2193 = vrot.lane.b32.xlu1 %v1970_v17, %s4338_s10  ;;  %4187 = vmatprep.subr.bf16.mxu1 %v6180_v32  ;;  %v4191_v17 = vpack.c.bf16 %v2361_v46, %v2360_v6  ;;  %v5368_v49 = vpop.permute.xlu1 %1993  ;;  %v4197_v6 = vpack.c.bf16 %v2365_v43, %v2364_v24  ;;  %v2366_v46 = vld [vmem:[%s6125_s2 + $0xf0] sm:$0xff] }
 0x5f8   :  { %2191 = vrot.lane.b32.xlu0 %v1969_v27, %s4338_s10  ;;  %v2363_v27 = vld [vmem:[%s6125_s2 + $0xd8] sm:$0xff] }
 0x5f9   :  { %v5377_v5 = vpop.permute.xlu0 %1991  ;;  %v4194_v26 = vpack.c.bf16 %v2363_v27, %v2362_v29  ;;  %v2368_v27 = vld [vmem:[%s6125_s2 + $0x100] sm:$0xff] }
 0x5fa   :  { %4189 = vmatpush1.bf16.msra.mxu1 %v4188_v63 }
 0x5fb   :  { %2129 = vrot.lane.b32.xlu1 %v1380_v36, %s4336_s7  ;;  %4190 = vmatprep.subr.bf16.mxu1 %v6180_v32  ;;  %v5386_v63 = vpop.permute.xlu1 %1997 }
 0x5fc   :  { %2127 = vrot.lane.b32.xlu0 %v1379_v59, %s4336_s7  ;;  %v2367_v59 = vld [vmem:[%s6125_s2 + $0xf8] sm:$0xff] }
 0x5fd   :  { %v5388_v36 = vpop.permute.xlu0 %1995 }
 0x5fe   :  { %4192 = vmatpush1.bf16.msra.mxu1 %v4191_v17  ;;  %v4200_v17 = vpack.c.bf16 %v2367_v59, %v2366_v46  ;;  %v2371_v46 = vld [vmem:[%s6125_s2 + $0x118] sm:$0xff] }
 0x5ff   :  { %4193 = vmatprep.subr.bf16.mxu1 %v6180_v32  ;;  %v5397_v29 = vpop.permute.xlu1 %2001 }
 0x601   :  { %v5406_v24 = vpop.permute.xlu0 %1999 }
 0x602   :  { %4195 = vmatpush1.bf16.msra.mxu1 %v4194_v26  ;;  %v2369_v26 = vld [vmem:[%s6125_s2 + $0x108] sm:$0xff] }
 0x603   :  { %4196 = vmatprep.subr.bf16.mxu1 %v6180_v32  ;;  %v4203_v43 = vpack.c.bf16 %v2369_v26, %v2368_v27  ;;  %v5415_v59 = vpop.permute.xlu1 %2005  ;;  %v2373_v27 = vld [vmem:[%s6125_s2 + $0x128] sm:$0xff] }
 0x605   :  { %v5417_v31 = vpop.permute.xlu0 %2003 }
 0x606   :  { %4198 = vmatpush1.bf16.msra.mxu1 %v4197_v6  ;;  %v2370_v6 = vld [vmem:[%s6125_s2 + $0x110] sm:$0xff] }
 0x607   :  { %4199 = vmatprep.subr.bf16.mxu1 %v6180_v32  ;;  %v4206_v51 = vpack.c.bf16 %v2371_v46, %v2370_v6  ;;  %v5426_v0 = vpop.permute.xlu1 %2009  ;;  %v2375_v6 = vld [vmem:[%s6125_s2 + $0x138] sm:$0xff] }
 0x609   :  { %v5435_v46 = vpop.permute.xlu0 %2007 }
 0x60a   :  { %4201 = vmatpush1.bf16.msra.mxu1 %v4200_v17  ;;  %v2372_v17 = vld [vmem:[%s6125_s2 + $0x120] sm:$0xff] }
 0x60b   :  { %4202 = vmatprep.subr.bf16.mxu1 %v6180_v32  ;;  %v4209_v26 = vpack.c.bf16 %v2373_v27, %v2372_v17  ;;  %v2377_v17 = vld [vmem:[%s6125_s2 + $0x148] sm:$0xff]  ;;  %v5444_v27 = vpop.permute.xlu1 %2013 }
 0x60d   :  { %v5446_v45 = vpop.permute.xlu0 %2011 }
 0x60e   :  { %4204 = vmatpush1.bf16.msra.mxu1 %v4203_v43  ;;  %v2374_v43 = vld [vmem:[%s6125_s2 + $0x130] sm:$0xff]  ;;  %6212 = vst [vmem:[#allocation17_spill] sm:$0xff] %v5446_v45 }
 0x60f   :  { %4205 = vmatprep.subr.bf16.mxu1 %v6180_v32  ;;  %v4212_v56 = vpack.c.bf16 %v2375_v6, %v2374_v43 }
 0x611   :  { %v5452_v43 = vpop.permute.xlu0 %2015 }
 0x612   :  { %4207 = vmatpush1.bf16.msra.mxu1 %v4206_v51  ;;  %v2376_v51 = vld [vmem:[%s6125_s2 + $0x140] sm:$0xff]  ;;  %6214 = vst [vmem:[#allocation19_spill] sm:$0xff] %v5452_v43 }
 0x613   :  { %4208 = vmatprep.subr.bf16.mxu1 %v6180_v32  ;;  %v4215_v53 = vpack.c.bf16 %v2377_v17, %v2376_v51 }
 0x615   :  { %v2100_v55 = vpop.permute.xlu0 %2099 }
 0x616   :  { %4210 = vmatpush1.bf16.msra.mxu1 %v4209_v26  ;;  %v5449_v26 = vpop.permute.xlu1 %2017 }
 0x617   :  { %4211 = vmatprep.subr.bf16.mxu1 %v6180_v32  ;;  %6213 = vst [vmem:[#allocation18_spill] sm:$0xff] %v5449_v26  ;;  %v6219_v26 = vmax.f32 %v4582_v23, 0.0  ;;  %v6221_v23 = vmax.f32 %v4590_v30, 0.0 }
 0x619   :  { %v2104_v33 = vpop.permute.xlu0 %2103  ;;  %v2211_v22 = vsel %vm36_vm0, %v6219_v26, %v5356_v15 }
 0x61a   :  { %4213 = vmatpush1.bf16.msra.mxu1 %v4212_v56  ;;  %v2102_v6 = vpop.permute.xlu1 %2101 }
 0x61b   :  { %4214 = vmatprep.subr.bf16.mxu1 %v6180_v32 }
 0x61d   :  { %v2108_v35 = vpop.permute.xlu0 %2107 }
 0x61e   :  { %4216 = vmatpush1.bf16.msra.mxu1 %v4215_v53  ;;  %v2106_v16 = vpop.permute.xlu1 %2105 }
 0x61f   :  { %4217 = vmatprep.subr.bf16.mxu1 %v6180_v32  ;;  %v6218_v32 = vmax.f32 %v4579_v19, 0.0  ;;  %v2228_v19 = vsel %vm2227_vm1, %v2211_v22, %v5275_v62  ;;  %v6223_v62 = vmax.f32 %v5122_v14, 0.0 }
 0x620   :  { %v5490_v26 = vsel %vm2244_vm2, %v2228_v19, %v2100_v55 }
 0x621   :  { %v2112_v42 = vpop.permute.xlu0 %2111  ;;  %v2212_v43 = vsel %vm36_vm0, %v6218_v32, %v5353_v60  ;;  %v2213_v60 = vsel %vm36_vm0, %v6221_v23, %v5377_v5  ;;  %v6224_v5 = vmax.f32 %v4601_v38, 0.0 }
 0x622   :  { %v2110_v37 = vpop.permute.xlu1 %2109 }
 0x623   :  { %v2216_v55 = vsel %vm36_vm0, %v6224_v5, %v5386_v63 }
 0x625   :  { %v5456_v56 = vpop.permute.xlu0 %2115 }
 0x626   :  { %v2114_v3 = vpop.permute.xlu1 %2113 }
 0x629   :  { %v5460_v53 = vpop.permute.xlu0 %2119 }
 0x62a   :  { %v5454_v45 = vpop.permute.xlu1 %2117  ;;  %6216 = vst [vmem:[#allocation21_spill] sm:$0xff] %v5460_v53 }
 0x62d   :  { %v5472_v47 = vpop.permute.xlu0 %2123 }
 0x62e   :  { %v5458_v51 = vpop.permute.xlu1 %2121 }
 0x62f   :  { %6215 = vst [vmem:[#allocation20_spill] sm:$0xff] %v5458_v51  ;;  %v6220_v51 = vmax.f32 %v4587_v28, 0.0  ;;  %v6222_v28 = vmax.f32 %v5128_v34, 0.0 }
 0x631   :  { %v2214_v53 = vsel %vm36_vm0, %v6220_v51, %v5368_v49  ;;  %v6225_v51 = vmax.f32 %v4604_v40, 0.0 }
 0x632   :  { %v5462_v17 = vpop.permute.xlu1 %2125  ;;  %v2231_v34 = vsel %vm2227_vm1, %v2214_v53, %v5277_v7  ;;  %v6226_v7 = vmax.f32 %v5137_v44, 0.0  ;;  %v6227_v53 = vmax.f32 %v5130_v41, 0.0  ;;  %v2233_v44 = vsel %vm2227_vm1, %v2216_v55, %v5281_v1 }
 0x633   :  { %6217 = vst [vmem:[#allocation22_spill] sm:$0xff] %v5462_v17  ;;  %v2229_v17 = vsel %vm2227_vm1, %v2212_v43, %v5273_v2  ;;  %v2230_v43 = vsel %vm2227_vm1, %v2213_v60, %v5279_v8  ;;  %v5519_v19 = vsel %vm2244_vm2, %v2231_v34, %v2106_v16  ;;  %v6228_v16 = vmax.f32 %v4615_v48, 0.0 }
 0x634   :  { %v5487_v15 = vsel %vm2244_vm2, %v2229_v17, %v2102_v6  ;;  %v2215_v17 = vsel %vm36_vm0, %v6225_v51, %v5388_v36  ;;  %v5522_v38 = vsel %vm2244_vm2, %v2230_v43, %v2104_v33  ;;  %v6229_v60 = vmax.f32 %v4618_v50, 0.0 }
 0x635   :  { %v4154_v14 = vpack.c.bf16 %v5487_v15, %v5490_v26  ;;  %v2218_v33 = vsel %vm36_vm0, %v6228_v16, %v5397_v29  ;;  %v2232_v36 = vsel %vm2227_vm1, %v2215_v17, %v5283_v10  ;;  %v4158_v41 = vpack.c.bf16 %v5519_v19, %v5522_v38  ;;  %v6242_v16 = vld [vmem:[#allocation12_spill] sm:$0xff] }
 0x636   :  { %v5554_v48 = vsel %vm2244_vm2, %v2232_v36, %v2108_v35  ;;  %v6230_v1 = vmax.f32 %v5149_v54, 0.0  ;;  %v6232_v35 = vmax.f32 %v4629_v58, 0.0  ;;  %v2235_v54 = vsel %vm2227_vm1, %v2218_v33, %v5287_v4  ;;  %v6243_v36 = vld [vmem:[#allocation17_spill] sm:$0xff] }
 0x637   :  { %v6233_v55 = vmax.f32 %v4632_v61, 0.0  ;;  %v5583_v43 = vsel %vm2244_vm2, %v2235_v54, %v2114_v3  ;;  %v6234_v4 = vmax.f32 %v5161_v20, 0.0  ;;  %v6237_v17 = vmax.f32 %v4646_v25, 0.0 }
 0x639   :  { %v2219_v34 = vsel %vm36_vm0, %v6233_v55, %v5417_v31 }
 0x63a   :  { %v2236_v31 = vsel %vm2227_vm1, %v2219_v34, %v5301_v12  ;;  %v6253_v34 = vld [vmem:[#allocation14_spill] sm:$0xff] }
 0x64d   :  { %v2166_v32 = vpop.permute.xlu1 %2165 }
 0x64e   :  { %v5495_v49 = vsel %vm36_vm0, %v6222_v28, %v2166_v32  ;;  %v2164_v2 = vpop.permute.xlu0 %2163  ;;  %v2217_v28 = vsel %vm36_vm0, %v6229_v60, %v5406_v24 }
 0x64f   :  { %v5500_v22 = vsel %vm36_vm0, %v6223_v62, %v2164_v2  ;;  %v5551_v2 = vsel %vm2244_vm2, %v2233_v44, %v2110_v37  ;;  %v6231_v62 = vmax.f32 %v5140_v11, 0.0  ;;  %v2220_v37 = vsel %vm36_vm0, %v6232_v35, %v5415_v59 }
 0x650   :  { %v4152_v30 = vpack.c.bf16 %v5495_v49, %v5500_v22  ;;  %v2234_v24 = vsel %vm2227_vm1, %v2217_v28, %v5291_v18  ;;  %v4162_v11 = vpack.c.bf16 %v5551_v2, %v5554_v48  ;;  %v2237_v20 = vsel %vm2227_vm1, %v2220_v37, %v5299_v9  ;;  %v6246_v28 = vld [vmem:[#allocation20_spill] sm:$0xff]  ;;  %v6250_v37 = vld [vmem:[#allocation5_spill] sm:$0xff] }
 0x651   :  { %v2170_v6 = vpop.permute.xlu1 %2169  ;;  %v5586_v58 = vsel %vm2244_vm2, %v2234_v24, %v2112_v42  ;;  %v6236_v42 = vmax.f32 %v4643_v21, 0.0  ;;  %v5616_v21 = vsel %vm2244_vm2, %v2237_v20, %v5454_v45  ;;  %v6238_v9 = vmax.f32 %v5173_v52, 0.0  ;;  %v6241_v52 = vld [vmem:[#allocation11_spill] sm:$0xff]  ;;  %v6255_v20 = vld [vmem:[#allocation8_spill] sm:$0xff] }
 0x652   :  { %v5527_v63 = vsel %vm36_vm0, %v6226_v7, %v2170_v6  ;;  %4153 = vmatprep.subr.bf16.mxu0 %v4152_v30  ;;  %v2168_v8 = vpop.permute.xlu0 %2167  ;;  %v6235_v6 = vmax.f32 %v5152_v13, 0.0  ;;  %v4166_v13 = vpack.c.bf16 %v5583_v43, %v5586_v58  ;;  %v2221_v7 = vsel %vm36_vm0, %v6237_v17, %v5435_v46  ;;  %v6258_v17 = vld [vmem:[#allocation7_spill] sm:$0xff] }
 0x653   :  { %v5532_v32 = vsel %vm36_vm0, %v6227_v53, %v2168_v8  ;;  %4155 = vmatpush1.bf16.msra.mxu0 %v4154_v14  ;;  %v2222_v3 = vsel %vm36_vm0, %v6236_v42, %v5426_v0  ;;  %v5620_v0 = vsel %vm2244_vm2, %v2236_v31, %v5456_v56  ;;  %v6239_v53 = vmax.f32 %v5164_v57, 0.0 }
 0x654   :  { %v4156_v40 = vpack.c.bf16 %v5527_v63, %v5532_v32  ;;  %v6240_v46 = vmax.f32 %v4657_v39, 0.0  ;;  %v2238_v33 = vsel %vm2227_vm1, %v2221_v7, %v6242_v16  ;;  %v4170_v57 = vpack.c.bf16 %v5616_v21, %v5620_v0  ;;  %v6264_v16 = vld [vmem:[#allocation10_spill] sm:$0xff] }
 0x655   :  { %v2174_v23 = vpop.permute.xlu1 %2173  ;;  %v6251_v54 = vmax.f32 %v6250_v37, 0.0  ;;  %v6256_v31 = vmax.f32 %v6255_v20, 0.0  ;;  %v6259_v7 = vmax.f32 %v6258_v17, 0.0  ;;  %v6277_v20 = vmov 0.0|0.0   ;;  %v2379_v17 = vld [vmem:[%s6125_s2 + $0x158] sm:$0xff] }
 0x656   :  { %v5559_v29 = vsel %vm36_vm0, %v6230_v1, %v2174_v23  ;;  %4157 = vmatprep.subr.bf16.mxu0 %v4156_v40  ;;  %v2172_v10 = vpop.permute.xlu0 %2171  ;;  %v2224_v56 = vsel %vm36_vm0, %v6240_v46, %v5444_v27  ;;  %v2239_v40 = vsel %vm2227_vm1, %v2222_v3, %v6241_v52  ;;  %v6244_v23 = vld [vmem:[#allocation2_spill] sm:$0xff]  ;;  %v6247_v27 = vld [vmem:[#allocation21_spill] sm:$0xff] }
 0x657   :  { %v5564_v30 = vsel %vm36_vm0, %v6231_v62, %v2172_v10  ;;  %4159 = vmatpush1.bf16.msra.mxu0 %v4158_v41  ;;  %v6245_v41 = vmax.f32 %v6244_v23, 0.0  ;;  %v5650_v39 = vsel %vm2244_vm2, %v2239_v40, %v6246_v28  ;;  %v5654_v1 = vsel %vm2244_vm2, %v2238_v33, %v6247_v27  ;;  %v6248_v10 = vld [vmem:[#allocation6_spill] sm:$0xff]  ;;  %v6268_v23 = vld [vmem:[#allocation4_spill] sm:$0xff]  ;;  %v6270_v28 = vld [vmem:[#allocation9_spill] sm:$0xff] }
 0x658   :  { %v4160_v50 = vpack.c.bf16 %v5559_v29, %v5564_v30  ;;  %v6249_v62 = vmax.f32 %v6248_v10, 0.0  ;;  %v6261_v46 = vld [vmem:[#allocation18_spill] sm:$0xff]  ;;  %v6265_v33 = vmax.f32 %v6264_v16, 0.0  ;;  %v6271_v27 = vmax.f32 %v6270_v28, 0.0 }
 0x659   :  { %v2178_v5 = vpop.permute.xlu1 %2177  ;;  %v2223_v60 = vsel %vm36_vm0, %v6245_v41, %v6243_v36  ;;  %v6267_v36 = vld [vmem:[#allocation19_spill] sm:$0xff]  ;;  %v6269_v41 = vmax.f32 %v6268_v23, 0.0  ;;  %v6278_v16 = vmov 0.0  }
 0x65a   :  { %v5591_v59 = vsel %vm36_vm0, %v6234_v4, %v2178_v5  ;;  %4161 = vmatprep.subr.bf16.mxu0 %v4160_v50  ;;  %v2176_v18 = vpop.permute.xlu0 %2175  ;;  %v2240_v4 = vsel %vm2227_vm1, %v2223_v60, %v6253_v34  ;;  %v6275_v34 = vld [vmem:[#allocation16_spill] sm:$0xff] }
 0x65b   :  { %v5596_v14 = vsel %vm36_vm0, %v6235_v6, %v2176_v18  ;;  %4163 = vmatpush1.bf16.msra.mxu0 %v4162_v11  ;;  %v6252_v11 = vld [vmem:[#allocation13_spill] sm:$0xff]  ;;  %v4174_v6 = vpack.c.bf16 %v5650_v39, %v5654_v1  ;;  %v5680_v3 = vsel %vm2244_vm2, %v2240_v4, %v5472_v47  ;;  %v2225_v60 = vsel %vm36_vm0, %v6269_v41, %v6267_v36 }
 0x65c   :  { %v4164_v61 = vpack.c.bf16 %v5591_v59, %v5596_v14  ;;  %v2241_v55 = vsel %vm2227_vm1, %v2224_v56, %v6252_v11  ;;  %v6262_v56 = vld [vmem:[#allocation3_spill] sm:$0xff]  ;;  %v2242_v4 = vsel %vm2227_vm1, %v2225_v60, %v6275_v34  ;;  %v3172_v60 = vld [vmem:[%s6125_s2 + $0x163] ss:$0 sm:$0xff] }
 0x65d   :  { %v2182_v51 = vpop.permute.xlu1 %2181  ;;  %v6263_v52 = vmax.f32 %v6262_v56, 0.0  ;;  %v2461_v56 = vld [vmem:[%s6125_s2 + $0x90] sm:$0xff] }
 0x65e   :  { %v5625_v12 = vsel %vm36_vm0, %v6238_v9, %v2182_v51  ;;  %4165 = vmatprep.subr.bf16.mxu0 %v4164_v61  ;;  %v2180_v8 = vpop.permute.xlu0 %2179  ;;  %v6254_v61 = vld [vmem:[#allocation22_spill] sm:$0xff] }
 0x65f   :  { %v5630_v25 = vsel %vm36_vm0, %v6239_v53, %v2180_v8  ;;  %4167 = vmatpush1.bf16.msra.mxu0 %v4166_v13  ;;  %v5676_v42 = vsel %vm2244_vm2, %v2241_v55, %v6254_v61  ;;  %v2277_v8 = vlaneseq  ;;  %v2226_v40 = vsel %vm36_vm0, %v6263_v52, %v6261_v46  ;;  %v2462_v52 = vld [vmem:[%s6125_s2 + $0x98] sm:$0xff] }
 0x660   :  { %v4168_v45 = vpack.c.bf16 %v5625_v12, %v5630_v25  ;;  %v4178_v47 = vpack.c.bf16 %v5676_v42, %v5680_v3 }
 0x661   :  { %v2186_v44 = vpop.permute.xlu1 %2185 }
 0x662   :  { %v5659_v50 = vsel %vm36_vm0, %v6249_v62, %v2186_v44  ;;  %4169 = vmatprep.subr.bf16.mxu0 %v4168_v45  ;;  %v2184_v35 = vpop.permute.xlu0 %2183  ;;  %v2278_v62 = vand.u32 127, %v2277_v8 }
 0x663   :  { %v5664_v24 = vsel %vm36_vm0, %v6251_v54, %v2184_v35  ;;  %4171 = vmatpush1.bf16.msra.mxu0 %v4170_v57  ;;  %v2280_v35 = vshrl.u32 %v2277_v8, 7  ;;  %v6273_v54 = vld [vmem:[#allocation15_spill] sm:$0xff]  ;;  %v2459_v8 = vld [vmem:[%s6125_s2 + $0x80] sm:$0xff] }
 0x664   :  { %v4172_v5 = vpack.c.bf16 %v5659_v50, %v5664_v24  ;;  %vm2281_vm3 = vcmp.lt.s32.totalorder %v2278_v62, 110 }
 0x665   :  { %v2190_v18 = vpop.permute.xlu1 %2189  ;;  %vm2282_vm4 = vcmp.eq.s32.totalorder %v2280_v35, 0 }
 0x666   :  { %v5685_v51 = vsel %vm36_vm0, %v6256_v31, %v2190_v18  ;;  %4173 = vmatprep.subr.bf16.mxu0 %v4172_v5  ;;  %v2188_v13 = vpop.permute.xlu0 %2187  ;;  %v2243_v5 = vsel %vm2227_vm1, %v2226_v40, %v6273_v54  ;;  %vm2283_vm5 = vmand %vm2281_vm3, %vm2282_vm4  ;;  %v4341_v31 = vmov 0.0002840909   ;;  %v4224_v40 = vpack.c.bf16 %v2462_v52, %v2461_v56 }
 0x667   :  { %6257 = vst [vmem:[#allocation11_spill] sm:$0xff] %v5685_v51  ;;  %v5690_v9 = vsel %vm36_vm0, %v6259_v7, %v2188_v13  ;;  %4175 = vmatpush1.bf16.msra.mxu0 %v4174_v6  ;;  %v2378_v13 = vld [vmem:[%s6125_s2 + $0x150] sm:$0xff] }
 0x668   :  { %6260 = vst [vmem:[#allocation12_spill] sm:$0xff] %v5690_v9  ;;  %v4176_v53 = vpack.c.bf16 %v5685_v51, %v5690_v9  ;;  %v4218_v7 = vpack.c.bf16 %v2379_v17, %v2378_v13 }
 0x669   :  { %v2194_v45 = vpop.permute.xlu1 %2193 }
 0x66a   :  { %v5703_v44 = vsel %vm36_vm0, %v6265_v33, %v2194_v45  ;;  %4177 = vmatprep.subr.bf16.mxu0 %v4176_v53  ;;  %v2192_v57 = vpop.permute.xlu0 %2191  ;;  %4219 = vmatpush1.bf16.msra.mxu1 %v4218_v7  ;;  %v2460_v53 = vld [vmem:[%s6125_s2 + $0x88] sm:$0xff]  ;;  %v3170_v33 = vld [vmem:[%s6125_s2 + $0x162] ss:$0 sm:$0xff] }
 0x66b   :  { %6266 = vst [vmem:[#allocation17_spill] sm:$0xff] %v5703_v44  ;;  %v5712_v10 = vsel %vm36_vm0, %v6271_v27, %v2192_v57  ;;  %4179 = vmatpush1.bf16.msra.mxu0 %v4178_v47  ;;  %v4221_v45 = vpack.c.bf16 %v2460_v53, %v2459_v8 }
 0x66c   :  { %6272 = vst [vmem:[#allocation2_spill] sm:$0xff] %v5712_v10  ;;  %v4180_v37 = vpack.c.bf16 %v5703_v44, %v5712_v10 }
 0x66d   :  { %v2130_v11 = vpop.permute.xlu1 %2129 }
 0x66e   :  { %v5719_v55 = vsel %vm2244_vm2, %v2243_v5, %v2130_v11  ;;  %4181 = vmatprep.subr.bf16.mxu0 %v4180_v37  ;;  %v2128_v18 = vpop.permute.xlu0 %2127  ;;  %v3175_v5 = vld [vmem:[%s6125_s2 + $0x164] ss:$0 sm:$0xff] }
 0x66f   :  { %6274 = vst [vmem:[#allocation20_spill] sm:$0xff] %v5719_v55  ;;  %v5724_v6 = vsel %vm2244_vm2, %v2242_v4, %v2128_v18 }
 0x670   :  { %6276 = vst [vmem:[#allocation21_spill] sm:$0xff] %v5724_v6  ;;  %v4182_v61 = vpack.c.bf16 %v5719_v55, %v5724_v6 }
 0x672   :  { %4183 = vmatpush1.bf16.msra.mxu0 %v4182_v61 }
 0x673   :  { %4220 = vmatprep.subr.bf16.mxu0 %v6277_v20 }
 0x675   :  { %3169 = vmatmul.mubr.msk.f32.vlgmr.msra.gmra.mrb[80].mxu0 %vm2283_vm5, %v4341_v31 }
 0x676   :  { %4222 = vmatpush3.bf16.msra.mxu0 %v4221_v45  ;;  %3925 = vmatprep.mubr.msk.f32.mxu0 %vm4342_vm6, %v6278_v16 }
 0x677   :  { %4223 = vmatprep.subr.bf16.mxu0 %v6277_v20 }
 0x67a   :  { %4225 = vmatpush3.bf16.msra.mxu0 %v4224_v40 }
 0x748   :  { %v2351_v47 = vpop.f32.mrb[80].mxu0 }
 0x749   :  { %v2353_v46 = vpop.f32.mrb[81].mxu0 }
 0x74a   :  { %3171 = vmatprep.mubr.msk.f32.mxu1 %vm2227_vm1, %v2353_v46 }
 0x74b   :  { %2453 = vmatmul.mubr.f32.vlgmr.msra.gmra.mrb[80].mxu1 %v2351_v47 }
 0x81e   :  { %v2454_v57 = vpop.f32.mrb[80].mxu1 }
 0x81f   :  { %v2455_v36 = vadd.f32 %v3170_v33, %v2454_v57  ;;  %v2456_v23 = vpop.f32.mrb[81].mxu1 }
 0x821   :  { %v2458_v41 = vmax.f32 %v2455_v36, 0.0 }
 0x823   :  { %3926 = vmatmul.mubr.msk.f32.vlgmr.msra.gmra.mrb[82].mxu0 %vm36_vm0, %v2458_v41 }
 0x8f6   :  { %v2537_v28 = vpop.f32.mrb[82].mxu0 }
 0x8f7   :  { %v2538_v27 = vadd.f32 %v3172_v60, %v2537_v28  ;;  %v3927_v62 = vpop.f32.mrb[83].mxu0 }
 0x8f8   :  { %v3030_v62 = vld [vmem:[%s6125_s2 + $0x165] sm:$0x1] }
 0x8f9   :  { %v3174_v35 = vmul.f32 -1.442695, %v2538_v27 }
 0x8fb   :  { %4332 = vpow2.f32 %v3174_v35 }
 0x905   :  { %v4333_v37 = vpop.eup %4332 }
 0x906   :  { %v2544_v54 = vadd.f32 1.0, %v4333_v37 }
 0x908   :  { %4334 = vrcp.f32 %v2544_v54 }
 0x912   :  { %v4335_v11 = vpop.eup %4334 }
 0x913   :  { %v2552_v34 = vmul.f32 %v4335_v11, %v3175_v5 }
 0x915   :  { %2690 = vrot.lane.b32.xlu1 %v2552_v34, %s4343_s29  ;;  %2589 = vrot.lane.b32.xlu0 %v2552_v34, %s4344_s30  ;;  %4226 = vpush %v2552_v34 }
 0x919   :  { %2892 = vrot.lane.b32.xlu1 %v2552_v34, %s4345_s1  ;;  %2791 = vrot.lane.b32.xlu0 %v2552_v34, %s4346_s4 }
 0x91d   :  { %2929 = vrot.lane.b32.xlu0 %v2552_v34, %s4347_s5 }
 0x946   :  { %s5760_s6 = spop %4226 }
 0x987   :  { %v2691_v4 = vpop.permute.xlu1 %2690  ;;  %v2590_v18 = vpop.permute.xlu0 %2589 }
 0x988   :  { %4228 = vpush %v2590_v18 }
 0x989   :  { %4230 = vpush %v2691_v4 }
 0x98b   :  { %v2893_v61 = vpop.permute.xlu1 %2892  ;;  %v2792_v20 = vpop.permute.xlu0 %2791 }
 0x98c   :  { %4232 = vpush %v2792_v20 }
 0x98d   :  { %4234 = vpush %v2893_v61 }
 0x98f   :  { %v2930_v31 = vpop.permute.xlu0 %2929 }
 0x990   :  { %4236 = vpush %v2930_v31 }
 0x991   :  { %4238 = vpush %v3030_v62 }
 0x9b9   :  { %s4229_s8 = spop %4228 }
 0x9ba   :  { %v2592_v13 = vstv %s4229_s8  ;;  %s4231_s9 = spop %4230 }
 0x9bb   :  { %v2595_v17 = vmul.f32 %v2592_v13, %v5487_v15  ;;  %v2594_v7 = vmul.f32 %v2592_v13, %v5490_v26  ;;  %v2597_v8 = vmul.f32 %v2592_v13, %v5519_v19  ;;  %v2596_v53 = vmul.f32 %v2592_v13, %v5522_v38 }
 0x9bc   :  { %v2599_v45 = vmul.f32 %v2592_v13, %v5551_v2  ;;  %v2598_v47 = vmul.f32 %v2592_v13, %v5554_v48  ;;  %v2601_v46 = vmul.f32 %v2592_v13, %v5583_v43  ;;  %v2600_v56 = vmul.f32 %v2592_v13, %v5586_v58 }
 0x9bd   :  { %2628 = vrot.lane.b32.xlu0 %v2595_v17, %s4336_s7  ;;  %2626 = vrot.lane.b32.xlu1 %v2594_v7, %s4336_s7  ;;  %v2603_v52 = vmul.f32 %v2592_v13, %v5616_v21  ;;  %v2602_v40 = vmul.f32 %v2592_v13, %v5620_v0  ;;  %v2605_v16 = vmul.f32 %v2592_v13, %v5650_v39  ;;  %v2693_v60 = vstv %s4231_s9  ;;  %s4233_s2 = spop %4232 }
 0x9be   :  { %v2604_v33 = vmul.f32 %v2592_v13, %v5654_v1  ;;  %v2607_v57 = vmul.f32 %v2592_v13, %v5676_v42  ;;  %v2606_v36 = vmul.f32 %v2592_v13, %v5680_v3  ;;  %v2609_v23 = vmul.f32 %v2592_v13, %v5719_v55 }
 0x9bf   :  { %v2608_v41 = vmul.f32 %v2592_v13, %v5724_v6  ;;  %v2696_v28 = vmul.f32 %v2693_v60, %v5487_v15  ;;  %v2695_v27 = vmul.f32 %v2693_v60, %v5490_v26  ;;  %v2698_v35 = vmul.f32 %v2693_v60, %v5519_v19 }
 0x9c0   :  { %v2697_v37 = vmul.f32 %v2693_v60, %v5522_v38  ;;  %v2700_v54 = vmul.f32 %v2693_v60, %v5551_v2  ;;  %v2699_v5 = vmul.f32 %v2693_v60, %v5554_v48  ;;  %v2702_v11 = vmul.f32 %v2693_v60, %v5583_v43 }
 0x9c1   :  { %2632 = vrot.lane.b32.xlu0 %v2597_v8, %s4336_s7  ;;  %2630 = vrot.lane.b32.xlu1 %v2596_v53, %s4336_s7  ;;  %v2701_v34 = vmul.f32 %v2693_v60, %v5586_v58  ;;  %v2704_v4 = vmul.f32 %v2693_v60, %v5616_v21  ;;  %v2703_v18 = vmul.f32 %v2693_v60, %v5620_v0  ;;  %v2794_v8 = vstv %s4233_s2 }
 0x9c2   :  { %v2706_v61 = vmul.f32 %v2693_v60, %v5650_v39  ;;  %v2705_v20 = vmul.f32 %v2693_v60, %v5654_v1  ;;  %v2708_v31 = vmul.f32 %v2693_v60, %v5676_v42  ;;  %v2707_v13 = vmul.f32 %v2693_v60, %v5680_v3 }
 0x9c3   :  { %v2710_v17 = vmul.f32 %v2693_v60, %v5719_v55  ;;  %v2709_v7 = vmul.f32 %v2693_v60, %v5724_v6  ;;  %v2797_v53 = vmul.f32 %v2794_v8, %v5487_v15  ;;  %v2808_v60 = vmul.f32 %v2794_v8, %v5680_v3 }
 0x9c5   :  { %2636 = vrot.lane.b32.xlu0 %v2599_v45, %s4336_s7  ;;  %2634 = vrot.lane.b32.xlu1 %v2598_v47, %s4336_s7  ;;  %v2796_v45 = vmul.f32 %v2794_v8, %v5490_v26  ;;  %v2799_v47 = vmul.f32 %v2794_v8, %v5519_v19 }
 0x9c9   :  { %2640 = vrot.lane.b32.xlu0 %v2601_v46, %s4336_s7  ;;  %2638 = vrot.lane.b32.xlu1 %v2600_v56, %s4336_s7  ;;  %v2798_v46 = vmul.f32 %v2794_v8, %v5522_v38  ;;  %v2801_v56 = vmul.f32 %v2794_v8, %v5551_v2 }
 0x9cd   :  { %2644 = vrot.lane.b32.xlu0 %v2603_v52, %s4336_s7  ;;  %2642 = vrot.lane.b32.xlu1 %v2602_v40, %s4336_s7  ;;  %v2800_v52 = vmul.f32 %v2794_v8, %v5554_v48  ;;  %v2803_v40 = vmul.f32 %v2794_v8, %v5583_v43 }
 0x9d1   :  { %2648 = vrot.lane.b32.xlu0 %v2605_v16, %s4336_s7  ;;  %2646 = vrot.lane.b32.xlu1 %v2604_v33, %s4336_s7  ;;  %v2802_v16 = vmul.f32 %v2794_v8, %v5586_v58  ;;  %v2805_v33 = vmul.f32 %v2794_v8, %v5616_v21 }
 0x9d5   :  { %2652 = vrot.lane.b32.xlu0 %v2607_v57, %s4336_s7  ;;  %2650 = vrot.lane.b32.xlu1 %v2606_v36, %s4336_s7  ;;  %v2804_v57 = vmul.f32 %v2794_v8, %v5620_v0  ;;  %v2807_v36 = vmul.f32 %v2794_v8, %v5650_v39 }
 0x9d9   :  { %2656 = vrot.lane.b32.xlu0 %v2609_v23, %s4336_s7  ;;  %2654 = vrot.lane.b32.xlu1 %v2608_v41, %s4336_s7  ;;  %v2806_v23 = vmul.f32 %v2794_v8, %v5654_v1  ;;  %v2809_v41 = vmul.f32 %v2794_v8, %v5676_v42 }
 0x9dd   :  { %2729 = vrot.lane.b32.xlu0 %v2696_v28, %s4337_s14  ;;  %2727 = vrot.lane.b32.xlu1 %v2695_v27, %s4337_s14  ;;  %v2811_v28 = vmul.f32 %v2794_v8, %v5719_v55  ;;  %v2810_v27 = vmul.f32 %v2794_v8, %v5724_v6 }
 0x9e1   :  { %2733 = vrot.lane.b32.xlu0 %v2698_v35, %s4337_s14  ;;  %2731 = vrot.lane.b32.xlu1 %v2697_v37, %s4337_s14 }
 0x9e5   :  { %2737 = vrot.lane.b32.xlu0 %v2700_v54, %s4337_s14  ;;  %2735 = vrot.lane.b32.xlu1 %v2699_v5, %s4337_s14 }
 0x9e9   :  { %2741 = vrot.lane.b32.xlu0 %v2702_v11, %s4337_s14  ;;  %2739 = vrot.lane.b32.xlu1 %v2701_v34, %s4337_s14 }
 0x9ed   :  { %2745 = vrot.lane.b32.xlu0 %v2704_v4, %s4337_s14  ;;  %2743 = vrot.lane.b32.xlu1 %v2703_v18, %s4337_s14 }
 0x9f1   :  { %2749 = vrot.lane.b32.xlu0 %v2706_v61, %s4337_s14  ;;  %2747 = vrot.lane.b32.xlu1 %v2705_v20, %s4337_s14 }
 0x9f5   :  { %2753 = vrot.lane.b32.xlu0 %v2708_v31, %s4337_s14  ;;  %2751 = vrot.lane.b32.xlu1 %v2707_v13, %s4337_s14 }
 0x9f9   :  { %2757 = vrot.lane.b32.xlu0 %v2710_v17, %s4337_s14  ;;  %2755 = vrot.lane.b32.xlu1 %v2709_v7, %s4337_s14  ;;  %s5855_s14 = spop %4234 }
 0x9fa   :  { %s4237_s12 = spop %4236 }
 0x9fb   :  { %v2932_v62 = vstv %s4237_s12 }
 0x9fc   :  { %v2935_v35 = vmul.f32 %v2932_v62, %v5495_v49  ;;  %v2934_v37 = vmul.f32 %v2932_v62, %v5500_v22  ;;  %v2937_v54 = vmul.f32 %v2932_v62, %v5527_v63  ;;  %v2936_v5 = vmul.f32 %v2932_v62, %v5532_v32 }
 0x9fd   :  { %2830 = vrot.lane.b32.xlu0 %v2797_v53, %s4338_s10  ;;  %2828 = vrot.lane.b32.xlu1 %v2796_v45, %s4338_s10  ;;  %v2939_v11 = vmul.f32 %v2932_v62, %v5559_v29  ;;  %v2938_v34 = vmul.f32 %v2932_v62, %v5564_v30  ;;  %v2941_v4 = vmul.f32 %v2932_v62, %v5591_v59 }
 0x9fe   :  { %v2940_v18 = vmul.f32 %v2932_v62, %v5596_v14  ;;  %v2943_v61 = vmul.f32 %v2932_v62, %v5625_v12  ;;  %v2942_v20 = vmul.f32 %v2932_v62, %v5630_v25  ;;  %v2945_v17 = vmul.f32 %v2932_v62, %v5659_v50 }
 0x9ff   :  { %v2944_v7 = vmul.f32 %v2932_v62, %v5664_v24  ;;  %v2947_v45 = vmul.f32 %v2932_v62, %v5685_v51 }
 0xa01   :  { %2834 = vrot.lane.b32.xlu0 %v2799_v47, %s4338_s10  ;;  %2832 = vrot.lane.b32.xlu1 %v2798_v46, %s4338_s10  ;;  %v2946_v47 = vmul.f32 %v2932_v62, %v5690_v9 }
 0xa05   :  { %2838 = vrot.lane.b32.xlu0 %v2801_v56, %s4338_s10  ;;  %2836 = vrot.lane.b32.xlu1 %v2800_v52, %s4338_s10  ;;  %v2949_v52 = vmul.f32 %v2932_v62, %v5703_v44 }
 0xa09   :  { %2842 = vrot.lane.b32.xlu0 %v2803_v40, %s4338_s10  ;;  %2840 = vrot.lane.b32.xlu1 %v2802_v16, %s4338_s10  ;;  %v2948_v40 = vmul.f32 %v2932_v62, %v5712_v10 }
 0xa0d   :  { %2846 = vrot.lane.b32.xlu0 %v2805_v33, %s4338_s10  ;;  %2844 = vrot.lane.b32.xlu1 %v2804_v57, %s4338_s10 }
 0xa11   :  { %2850 = vrot.lane.b32.xlu0 %v2807_v36, %s4338_s10  ;;  %2848 = vrot.lane.b32.xlu1 %v2806_v23, %s4338_s10 }
 0xa15   :  { %2854 = vrot.lane.b32.xlu0 %v2809_v41, %s4338_s10  ;;  %2852 = vrot.lane.b32.xlu1 %v2808_v60, %s4338_s10 }
 0xa19   :  { %2858 = vrot.lane.b32.xlu0 %v2811_v28, %s4338_s10  ;;  %2856 = vrot.lane.b32.xlu1 %v2810_v27, %s4338_s10 }
 0xa1d   :  { %2968 = vrot.lane.b32.xlu0 %v2935_v35, %s4336_s7  ;;  %2966 = vrot.lane.b32.xlu1 %v2934_v37, %s4336_s7 }
 0xa21   :  { %2972 = vrot.lane.b32.xlu0 %v2937_v54, %s4336_s7  ;;  %2970 = vrot.lane.b32.xlu1 %v2936_v5, %s4336_s7 }
 0xa25   :  { %2976 = vrot.lane.b32.xlu0 %v2939_v11, %s4336_s7  ;;  %2974 = vrot.lane.b32.xlu1 %v2938_v34, %s4336_s7 }
 0xa29   :  { %2980 = vrot.lane.b32.xlu0 %v2941_v4, %s4336_s7  ;;  %2978 = vrot.lane.b32.xlu1 %v2940_v18, %s4336_s7 }
 0xa2d   :  { %2984 = vrot.lane.b32.xlu0 %v2943_v61, %s4336_s7  ;;  %2982 = vrot.lane.b32.xlu1 %v2942_v20, %s4336_s7 }
 0xa2f   :  { %v2629_v31 = vpop.permute.xlu0 %2628  ;;  %v2627_v13 = vpop.permute.xlu1 %2626 }
 0xa31   :  { %2988 = vrot.lane.b32.xlu0 %v2945_v17, %s4336_s7  ;;  %2986 = vrot.lane.b32.xlu1 %v2944_v7, %s4336_s7 }
 0xa33   :  { %v2633_v8 = vpop.permute.xlu0 %2632  ;;  %v2631_v53 = vpop.permute.xlu1 %2630 }
 0xa35   :  { %2992 = vrot.lane.b32.xlu0 %v2947_v45, %s4336_s7  ;;  %2990 = vrot.lane.b32.xlu1 %v2946_v47, %s4336_s7  ;;  %v5924_v45 = vstv %s5760_s6 }
 0xa36   :  { %v2557_v10 = vmul.f32 %v5924_v45, %v5490_v26  ;;  %v2560_v6 = vmul.f32 %v5924_v45, %v5519_v19  ;;  %v2562_v19 = vmul.f32 %v5924_v45, %v5551_v2 }
 0xa37   :  { %v2637_v46 = vpop.permute.xlu0 %2636  ;;  %v2635_v56 = vpop.permute.xlu1 %2634 }
 0xa38   :  { %v2674_v51 = vadd.f32 %v2627_v13, %v2557_v10 }
 0xa39   :  { %2996 = vrot.lane.b32.xlu0 %v2949_v52, %s4336_s7  ;;  %2994 = vrot.lane.b32.xlu1 %v2948_v40, %s4336_s7  ;;  %v2558_v40 = vmul.f32 %v5924_v45, %v5487_v15  ;;  %s4239_s7 = spop %4238 }
 0xa3b   :  { %v5895_v16 = vpop.permute.xlu0 %2640  ;;  %v5897_v33 = vpop.permute.xlu1 %2638  ;;  %v2675_v9 = vadd.f32 %v2629_v31, %v2558_v40 }
 0xa3f   :  { %v5899_v57 = vpop.permute.xlu0 %2644  ;;  %v5901_v36 = vpop.permute.xlu1 %2642 }
 0xa43   :  { %v5903_v23 = vpop.permute.xlu0 %2648  ;;  %v5905_v41 = vpop.permute.xlu1 %2646 }
 0xa47   :  { %v5907_v60 = vpop.permute.xlu0 %2652  ;;  %v5909_v28 = vpop.permute.xlu1 %2650 }
 0xa48   :  { %6279 = vst [vmem:[#allocation6_spill] sm:$0xff] %v5907_v60  ;;  %6280 = vst [vmem:[#allocation5_spill] sm:$0xff] %v5909_v28 }
 0xa4b   :  { %v5911_v27 = vpop.permute.xlu0 %2656  ;;  %v5913_v62 = vpop.permute.xlu1 %2654 }
 0xa4c   :  { %6281 = vst [vmem:[#allocation13_spill] sm:$0xff] %v5911_v27  ;;  %6282 = vst [vmem:[#allocation14_spill] sm:$0xff] %v5913_v62  ;;  %v5939_v27 = vstv %s5855_s14 }
 0xa4d   :  { %v2898_v26 = vmul.f32 %v5939_v27, %v5495_v49 }
 0xa4f   :  { %v2730_v35 = vpop.permute.xlu0 %2729  ;;  %v2728_v37 = vpop.permute.xlu1 %2727 }
 0xa50   :  { %v2775_v55 = vadd.f32 %v2728_v37, %v2674_v51 }
 0xa53   :  { %v2734_v54 = vpop.permute.xlu0 %2733  ;;  %v2732_v5 = vpop.permute.xlu1 %2731 }
 0xa57   :  { %v2738_v11 = vpop.permute.xlu0 %2737  ;;  %v2736_v34 = vpop.permute.xlu1 %2735 }
 0xa5b   :  { %v2742_v4 = vpop.permute.xlu0 %2741  ;;  %v2740_v18 = vpop.permute.xlu1 %2739 }
 0xa5f   :  { %v5915_v61 = vpop.permute.xlu0 %2745  ;;  %v5917_v20 = vpop.permute.xlu1 %2743 }
 0xa63   :  { %v5919_v17 = vpop.permute.xlu0 %2749  ;;  %v5921_v7 = vpop.permute.xlu1 %2747 }
 0xa67   :  { %v5926_v47 = vpop.permute.xlu0 %2753  ;;  %v5928_v52 = vpop.permute.xlu1 %2751 }
 0xa68   :  { %6283 = vst [vmem:[#allocation22_spill] sm:$0xff] %v5926_v47  ;;  %6284 = vst [vmem:[#allocation8_spill] sm:$0xff] %v5928_v52  ;;  %v2559_v52 = vmul.f32 %v5924_v45, %v5522_v38  ;;  %v2776_v47 = vadd.f32 %v2730_v35, %v2675_v9  ;;  %v2561_v38 = vmul.f32 %v5924_v45, %v5554_v48 }
 0xa69   :  { %v2564_v48 = vmul.f32 %v5924_v45, %v5583_v43 }
 0xa6a   :  { %v2676_v60 = vadd.f32 %v2631_v53, %v2559_v52 }
 0xa6b   :  { %v5934_v44 = vpop.permute.xlu0 %2757  ;;  %v5936_v62 = vpop.permute.xlu1 %2755 }
 0xa6c   :  { %6285 = vst [vmem:[#allocation7_spill] sm:$0xff] %v5934_v44  ;;  %6286 = vst [vmem:[#allocation18_spill] sm:$0xff] %v5936_v62  ;;  %v2897_v62 = vmul.f32 %v5939_v27, %v5500_v22  ;;  %v2677_v44 = vadd.f32 %v2633_v8, %v2560_v6  ;;  %v2777_v51 = vadd.f32 %v2732_v5, %v2676_v60 }
 0xa6d   :  { %v2900_v22 = vmul.f32 %v5939_v27, %v5527_v63  ;;  %v2679_v6 = vadd.f32 %v2637_v46, %v2562_v19  ;;  %v2678_v8 = vadd.f32 %v2635_v56, %v2561_v38  ;;  %v2901_v46 = vmul.f32 %v5939_v27, %v5564_v30 }
 0xa6e   :  { %v2778_v9 = vadd.f32 %v2734_v54, %v2677_v44  ;;  %v2563_v44 = vmul.f32 %v5924_v45, %v5586_v58  ;;  %v2681_v56 = vadd.f32 %v5895_v16, %v2564_v48  ;;  %v2904_v16 = vmul.f32 %v5939_v27, %v5591_v59 }
 0xa6f   :  { %v2831_v15 = vpop.permute.xlu0 %2830  ;;  %v2829_v28 = vpop.permute.xlu1 %2828  ;;  %v2780_v60 = vadd.f32 %v2738_v11, %v2679_v6  ;;  %v2566_v11 = vmul.f32 %v5924_v45, %v5616_v21 }
 0xa70   :  { %v2877_v31 = vadd.f32 %v2831_v15, %v2776_v47  ;;  %v2876_v10 = vadd.f32 %v2829_v28, %v2775_v55  ;;  %v2899_v55 = vmul.f32 %v5939_v27, %v5532_v32  ;;  %v2779_v28 = vadd.f32 %v2736_v34, %v2678_v8 }
 0xa71   :  { %v2902_v32 = vmul.f32 %v5939_v27, %v5559_v29  ;;  %v2680_v43 = vadd.f32 %v5897_v33, %v2563_v44  ;;  %v2565_v34 = vmul.f32 %v5924_v45, %v5620_v0  ;;  %v2782_v52 = vadd.f32 %v2742_v4, %v2681_v56  ;;  %v6289_v44 = vld [vmem:[#allocation20_spill] sm:$0xff] }
 0xa72   :  { %v5953_v13 = vadd.f32 %v2898_v26, %v2877_v31  ;;  %v5955_v35 = vadd.f32 %v2897_v62, %v2876_v10  ;;  %v2903_v33 = vmul.f32 %v5939_v27, %v5596_v14  ;;  %v2683_v31 = vadd.f32 %v5899_v57, %v2566_v11  ;;  %v6294_v11 = vld [vmem:[#allocation12_spill] sm:$0xff] }
 0xa73   :  { %v2835_v49 = vpop.permute.xlu0 %2834  ;;  %v2833_v37 = vpop.permute.xlu1 %2832  ;;  %v2781_v40 = vadd.f32 %v2740_v18, %v2680_v43  ;;  %v2682_v21 = vadd.f32 %v5901_v36, %v2565_v34  ;;  %v2568_v4 = vmul.f32 %v5924_v45, %v5650_v39  ;;  %v2567_v18 = vmul.f32 %v5924_v45, %v5654_v1 }
 0xa74   :  { %v2879_v2 = vadd.f32 %v2835_v49, %v2778_v9  ;;  %v2878_v53 = vadd.f32 %v2833_v37, %v2777_v51  ;;  %v2784_v19 = vadd.f32 %v5915_v61, %v2683_v31  ;;  %v2906_v36 = vmul.f32 %v5939_v27, %v5625_v12 }
 0xa75   :  { %v2783_v38 = vadd.f32 %v5917_v20, %v2682_v21  ;;  %v2905_v51 = vmul.f32 %v5939_v27, %v5630_v25  ;;  %v2685_v39 = vadd.f32 %v5903_v23, %v2568_v4  ;;  %v2684_v1 = vadd.f32 %v5905_v41, %v2567_v18  ;;  %v6298_v21 = vld [vmem:[#allocation18_spill] sm:$0xff] }
 0xa76   :  { %v5965_v62 = vadd.f32 %v2900_v22, %v2879_v2  ;;  %v5967_v54 = vadd.f32 %v2899_v55, %v2878_v53  ;;  %v2570_v20 = vmul.f32 %v5924_v45, %v5676_v42  ;;  %v2569_v37 = vmul.f32 %v5924_v45, %v5680_v3  ;;  %v6287_v42 = vld [vmem:[#allocation6_spill] sm:$0xff]  ;;  %v6288_v53 = vld [vmem:[#allocation5_spill] sm:$0xff] }
 0xa77   :  { %v2839_v63 = vpop.permute.xlu0 %2838  ;;  %v2837_v5 = vpop.permute.xlu1 %2836  ;;  %v2786_v22 = vadd.f32 %v5919_v17, %v2685_v39  ;;  %v2785_v55 = vadd.f32 %v5921_v7, %v2684_v1  ;;  %v2908_v41 = vmul.f32 %v5939_v27, %v5659_v50  ;;  %v2907_v8 = vmul.f32 %v5939_v27, %v5664_v24 }
 0xa78   :  { %v2881_v47 = vadd.f32 %v2839_v63, %v2780_v60  ;;  %v2880_v58 = vadd.f32 %v2837_v5, %v2779_v28  ;;  %v2687_v2 = vadd.f32 %v6287_v42, %v2570_v20  ;;  %v2686_v3 = vadd.f32 %v6288_v53, %v2569_v37  ;;  %v6290_v60 = vld [vmem:[#allocation21_spill] sm:$0xff]  ;;  %v6291_v63 = vld [vmem:[#allocation22_spill] sm:$0xff] }
 0xa79   :  { %v2572_v7 = vmul.f32 %v5924_v45, %v6289_v44  ;;  %v2571_v28 = vmul.f32 %v5924_v45, %v6290_v60  ;;  %v2909_v34 = vmul.f32 %v5939_v27, %v6294_v11  ;;  %v3033_v37 = vstv %s4239_s7 }
 0xa7a   :  { %v5979_v15 = vadd.f32 %v2902_v32, %v2881_v47  ;;  %v5981_v29 = vadd.f32 %v2901_v46, %v2880_v58  ;;  %v2788_v5 = vadd.f32 %v6291_v63, %v2687_v2  ;;  %v6292_v32 = vld [vmem:[#allocation8_spill] sm:$0xff]  ;;  %v6293_v47 = vld [vmem:[#allocation11_spill] sm:$0xff] }
 0xa7b   :  { %v2843_v26 = vpop.permute.xlu0 %2842  ;;  %v2841_v30 = vpop.permute.xlu1 %2840  ;;  %v2787_v46 = vadd.f32 %v6292_v32, %v2686_v3  ;;  %v2910_v58 = vmul.f32 %v5939_v27, %v6293_v47 }
 0xa7c   :  { %v2883_v10 = vadd.f32 %v2843_v26, %v2782_v52  ;;  %v2882_v0 = vadd.f32 %v2841_v30, %v2781_v40  ;;  %v6295_v52 = vld [vmem:[#allocation13_spill] sm:$0xff]  ;;  %v6296_v26 = vld [vmem:[#allocation14_spill] sm:$0xff] }
 0xa7d   :  { %v2689_v40 = vadd.f32 %v6295_v52, %v2572_v7  ;;  %v2688_v45 = vadd.f32 %v6296_v26, %v2571_v28 }
 0xa7e   :  { %v5995_v59 = vadd.f32 %v2904_v16, %v2883_v10  ;;  %v5997_v9 = vadd.f32 %v2903_v33, %v2882_v0  ;;  %v6297_v33 = vld [vmem:[#allocation7_spill] sm:$0xff] }
 0xa7f   :  { %v2847_v14 = vpop.permute.xlu0 %2846  ;;  %v2845_v57 = vpop.permute.xlu1 %2844  ;;  %v2790_v31 = vadd.f32 %v6297_v33, %v2689_v40  ;;  %v2789_v10 = vadd.f32 %v6298_v21, %v2688_v45 }
 0xa80   :  { %v2885_v49 = vadd.f32 %v2847_v14, %v2784_v19  ;;  %v2884_v61 = vadd.f32 %v2845_v57, %v2783_v38  ;;  %v6299_v57 = vld [vmem:[#allocation17_spill] sm:$0xff] }
 0xa82   :  { %v6011_v12 = vadd.f32 %v2906_v36, %v2885_v49  ;;  %v6013_v6 = vadd.f32 %v2905_v51, %v2884_v61  ;;  %v2912_v36 = vmul.f32 %v5939_v27, %v6299_v57  ;;  %v6300_v51 = vld [vmem:[#allocation2_spill] sm:$0xff] }
 0xa83   :  { %v2851_v25 = vpop.permute.xlu0 %2850  ;;  %v2849_v23 = vpop.permute.xlu1 %2848  ;;  %v2911_v39 = vmul.f32 %v5939_v27, %v6300_v51 }
 0xa84   :  { %v2887_v48 = vadd.f32 %v2851_v25, %v2786_v22  ;;  %v2886_v17 = vadd.f32 %v2849_v23, %v2785_v55 }
 0xa86   :  { %v6027_v50 = vadd.f32 %v2908_v41, %v2887_v48  ;;  %v6029_v56 = vadd.f32 %v2907_v8, %v2886_v17 }
 0xa87   :  { %v2855_v24 = vpop.permute.xlu0 %2854  ;;  %v2853_v43 = vpop.permute.xlu1 %2852 }
 0xa88   :  { %v2889_v30 = vadd.f32 %v2855_v24, %v2788_v5  ;;  %v2888_v16 = vadd.f32 %v2853_v43, %v2787_v46 }
 0xa8a   :  { %v6039_v0 = vadd.f32 %v2910_v58, %v2889_v30  ;;  %v6041_v4 = vadd.f32 %v2909_v34, %v2888_v16 }
 0xa8b   :  { %v2859_v18 = vpop.permute.xlu0 %2858  ;;  %v2857_v19 = vpop.permute.xlu1 %2856 }
 0xa8c   :  { %v2891_v38 = vadd.f32 %v2859_v18, %v2790_v31  ;;  %v2890_v14 = vadd.f32 %v2857_v19, %v2789_v10 }
 0xa8e   :  { %v2928_v1 = vadd.f32 %v2912_v36, %v2891_v38  ;;  %v2927_v49 = vadd.f32 %v2911_v39, %v2890_v14 }
 0xa8f   :  { %v2969_v61 = vpop.permute.xlu0 %2968  ;;  %v2967_v20 = vpop.permute.xlu1 %2966 }
 0xa90   :  { %v3015_v22 = vadd.f32 %v2969_v61, %v5953_v13  ;;  %v3014_v55 = vadd.f32 %v2967_v20, %v5955_v35 }
 0xa92   :  { %v3035_v25 = vadd.f32 %v3033_v37, %v3014_v55  ;;  %v3036_v23 = vadd.f32 %v3033_v37, %v3015_v22 }
 0xa93   :  { %v2973_v41 = vpop.permute.xlu0 %2972  ;;  %v2971_v8 = vpop.permute.xlu1 %2970 }
 0xa94   :  { %3051 = vst.msk [vmem:[%s6128_s3] sm:$0xff] %vm36_vm0, %v3035_v25  ;;  %3052 = vst.msk [vmem:[%s6128_s3 + $0x8] sm:$0xff] %vm36_vm0, %v3036_v23  ;;  %v3017_v27 = vadd.f32 %v2973_v41, %v5965_v62  ;;  %v3016_v13 = vadd.f32 %v2971_v8, %v5967_v54 }
 0xa96   :  { %v3038_v42 = vadd.f32 %v3033_v37, %v3017_v27  ;;  %v3037_v35 = vadd.f32 %v3033_v37, %v3016_v13 }
 0xa97   :  { %v2977_v2 = vpop.permute.xlu0 %2976  ;;  %v2975_v53 = vpop.permute.xlu1 %2974 }
 0xa98   :  { %3054 = vst.msk [vmem:[%s6128_s3 + $0x18] sm:$0xff] %vm36_vm0, %v3038_v42  ;;  %3053 = vst.msk [vmem:[%s6128_s3 + $0x10] sm:$0xff] %vm36_vm0, %v3037_v35  ;;  %v3019_v3 = vadd.f32 %v2977_v2, %v5979_v15  ;;  %v3018_v62 = vadd.f32 %v2975_v53, %v5981_v29 }
 0xa9a   :  { %v3040_v48 = vadd.f32 %v3033_v37, %v3019_v3  ;;  %v3039_v54 = vadd.f32 %v3033_v37, %v3018_v62 }
 0xa9b   :  { %v2981_v17 = vpop.permute.xlu0 %2980  ;;  %v2979_v44 = vpop.permute.xlu1 %2978 }
 0xa9c   :  { %3056 = vst.msk [vmem:[%s6128_s3 + $0x28] sm:$0xff] %vm36_vm0, %v3040_v48  ;;  %3055 = vst.msk [vmem:[%s6128_s3 + $0x20] sm:$0xff] %vm36_vm0, %v3039_v54  ;;  %v3021_v7 = vadd.f32 %v2981_v17, %v5995_v59  ;;  %v3020_v15 = vadd.f32 %v2979_v44, %v5997_v9 }
 0xa9e   :  { %v3042_v60 = vadd.f32 %v3033_v37, %v3021_v7  ;;  %v3041_v29 = vadd.f32 %v3033_v37, %v3020_v15 }
 0xa9f   :  { %v2985_v28 = vpop.permute.xlu0 %2984  ;;  %v2983_v63 = vpop.permute.xlu1 %2982 }
 0xaa0   :  { %3058 = vst.msk [vmem:[%s6128_s3 + $0x38] sm:$0xff] %vm36_vm0, %v3042_v60  ;;  %3057 = vst.msk [vmem:[%s6128_s3 + $0x30] sm:$0xff] %vm36_vm0, %v3041_v29  ;;  %v3023_v5 = vadd.f32 %v2985_v28, %v6011_v12  ;;  %v3022_v59 = vadd.f32 %v2983_v63, %v6013_v6 }
 0xaa2   :  { %v3044_v32 = vadd.f32 %v3033_v37, %v3023_v5  ;;  %v3043_v9 = vadd.f32 %v3033_v37, %v3022_v59 }
 0xaa3   :  { %v2989_v46 = vpop.permute.xlu0 %2988  ;;  %v2987_v24 = vpop.permute.xlu1 %2986 }
 0xaa4   :  { %3060 = vst.msk [vmem:[%s6128_s3 + $0x48] sm:$0xff] %vm36_vm0, %v3044_v32  ;;  %3059 = vst.msk [vmem:[%s6128_s3 + $0x40] sm:$0xff] %vm36_vm0, %v3043_v9  ;;  %v3025_v43 = vadd.f32 %v2989_v46, %v6027_v50  ;;  %v3024_v12 = vadd.f32 %v2987_v24, %v6029_v56 }
 0xaa6   :  { %v3046_v47 = vadd.f32 %v3033_v37, %v3025_v43  ;;  %v3045_v6 = vadd.f32 %v3033_v37, %v3024_v12 }
 0xaa7   :  { %v2993_v58 = vpop.permute.xlu0 %2992  ;;  %v2991_v11 = vpop.permute.xlu1 %2990 }
 0xaa8   :  { %3062 = vst.msk [vmem:[%s6128_s3 + $0x58] sm:$0xff] %vm36_vm0, %v3046_v47  ;;  %3061 = vst.msk [vmem:[%s6128_s3 + $0x50] sm:$0xff] %vm36_vm0, %v3045_v6  ;;  %v3027_v34 = vadd.f32 %v2993_v58, %v6039_v0  ;;  %v3026_v50 = vadd.f32 %v2991_v11, %v6041_v4 }
 0xaaa   :  { %v3048_v52 = vadd.f32 %v3033_v37, %v3027_v34  ;;  %v3047_v56 = vadd.f32 %v3033_v37, %v3026_v50 }
 0xaab   :  { %v2997_v40 = vpop.permute.xlu0 %2996  ;;  %v2995_v26 = vpop.permute.xlu1 %2994 }
 0xaac   :  { %3064 = vst.msk [vmem:[%s6128_s3 + $0x68] sm:$0xff] %vm36_vm0, %v3048_v52  ;;  %3063 = vst.msk [vmem:[%s6128_s3 + $0x60] sm:$0xff] %vm36_vm0, %v3047_v56  ;;  %v3029_v45 = vadd.f32 %v2997_v40, %v2928_v1  ;;  %v3028_v30 = vadd.f32 %v2995_v26, %v2927_v49 }
 0xaae   :  { %v3050_v16 = vadd.f32 %v3033_v37, %v3029_v45  ;;  %v3049_v33 = vadd.f32 %v3033_v37, %v3028_v30 }
 0xab0   :  { %3066 = vst.msk [vmem:[%s6128_s3 + $0x78] sm:$0xff] %vm36_vm0, %v3050_v16  ;;  %3065 = vst.msk [vmem:[%s6128_s3 + $0x70] sm:$0xff] %vm36_vm0, %v3049_v33 }

</bundles_post_ra>
